<compile_context>
chip_gen: v7x
topology: tpu7x:2x2x1
jax: 0.10.0
libtpu: 0.0.40
codegen_flags: <defaults>
</compile_context>

<pallas_src>
import functools

import jax
import jax.numpy as jnp
from jax import lax
from jax.experimental import pallas as pl
from jax.experimental.pallas import tpu as pltpu

LANE = 128      # padded per-gate lane width (hidden H zero-padded to 128)
OUT_PAD = 128   # padded logits width (real logits live in cols 0:2)
VOCAB = 16


def lstm_fc_kernel(tok_ref, gx_table_ref, whh_ref, fcw_ref, fcb_ref, out_ref,
                   *, B, T):
    """Full LSTM recurrence + final Linear in one kernel invocation.

    tok_ref      : (B*T,) int32 SMEM      flattened tokens, index = b*T + t
    gx_table_ref : (16, 1, 4*LANE) f32    per-vocab  emb@W_ih^T + (b_ih+b_hh),
                                          gate blocks in (i, f, o, g) order,
                                          each zero-padded from H to LANE lanes
    whh_ref      : (LANE, 4*LANE) bf16    hidden->gates weights, same layout
    fcw_ref      : (LANE, OUT_PAD) f32    fc weight, zero-padded
    fcb_ref      : (1, OUT_PAD) f32       fc bias, zero-padded
    out_ref      : (B, OUT_PAD) f32       padded logits
    """
    h0 = jnp.zeros((B, LANE), jnp.float32)
    c0 = jnp.zeros((B, LANE), jnp.float32)

    def step(t, carry):
        h, c = carry
        # In-kernel token gather: one (1, 4*LANE) row per batch element,
        # selected by an SMEM scalar read (input projection is precomputed,
        # so this is off the h->h critical path).
        rows = [gx_table_ref[tok_ref[b * T + t]] for b in range(B)]
        gx_t = rows[0] if B == 1 else jnp.concatenate(rows, axis=0)  # (B, 4*LANE)

        # Single recurrent MXU dot per step: bf16 inputs, f32 accumulation.
        # TODO(synk): if the bundle dump shows the (LANE, 4*LANE) RHS being
        # re-pushed on every unrolled step, hold W_hh stationary with
        # pltpu.matmul_push_rhs / matmul_acc_lhs / matmul_pop instead.
        gates = gx_t + jnp.dot(h.astype(jnp.bfloat16), whh_ref[...],
                               preferred_element_type=jnp.float32)

        # One wide sigmoid over the contiguous i|f|o blocks, one tanh for g.
        sig = jax.nn.sigmoid(gates[:, : 3 * LANE])
        i_g = sig[:, 0 * LANE: 1 * LANE]
        f_g = sig[:, 1 * LANE: 2 * LANE]
        o_g = sig[:, 2 * LANE: 3 * LANE]
        g_g = jnp.tanh(gates[:, 3 * LANE: 4 * LANE])
        c_new = f_g * c + i_g * g_g
        h_new = o_g * jnp.tanh(c_new)
        return (h_new, c_new)

    # T is tiny and static: fully unroll so the LLO scheduler can interleave
    # MXU / EUP / VPU work across adjacent timesteps.
    h_fin, _ = lax.fori_loop(0, T, step, (h0, c0), unroll=True)

    # fc(lstm_out[:, -1]) — lane-dense padded output slab.
    out_ref[...] = (jnp.dot(h_fin, fcw_ref[...],
                            preferred_element_type=jnp.float32)
                    + fcb_ref[...])


def _relayout_gates(a, H):
    """(..., 4H) in PyTorch gate order (i,f,g,o) -> (..., 4*LANE) in order
    (i, f, o, g), each gate block zero-padded from H to LANE lanes."""
    i, f, g, o = jnp.split(a, 4, axis=-1)
    pad = [(0, 0)] * (a.ndim - 1) + [(0, LANE - H)]
    return jnp.concatenate([jnp.pad(b, pad) for b in (i, f, o, g)], axis=-1)


def prepare_params(params):
    """Parameter-only preprocessing, hoisted out of the per-call forward.

    Pure function of the weights — compute once at weight-load time."""
    emb = params["embedding"]                     # (16, H)
    H = emb.shape[1]
    hp = lax.Precision.HIGHEST

    # Bias added BEFORE padding so padded gate pre-activations stay exactly 0.
    bias = params["b_ih"] + params["b_hh"]                               # (4H,)
    gx_table = jnp.dot(emb, params["w_ih"].T, precision=hp) + bias       # (16, 4H)
    gx_table = _relayout_gates(gx_table, H)                              # (16, 4*LANE)
    gx_table = gx_table.reshape(VOCAB, 1, 4 * LANE).astype(jnp.float32)

    # Hidden->gates weights: relayout columns, zero-pad rows H -> LANE, bf16.
    whh = _relayout_gates(params["w_hh"].T, H)                           # (H, 4*LANE)
    whh = jnp.pad(whh, ((0, LANE - H), (0, 0))).astype(jnp.bfloat16)     # (LANE, 4*LANE)

    # FC weight/bias, zero-padded to a lane-dense output slab.
    fcw = jnp.pad(params["fc_w"].T,
                  ((0, LANE - H), (0, OUT_PAD - 2))).astype(jnp.float32)  # (LANE, OUT_PAD)
    fcb = jnp.pad(params["fc_b"],
                  (0, OUT_PAD - 2)).reshape(1, OUT_PAD).astype(jnp.float32)

    return {"gx_table": gx_table, "whh": whh, "fcw": fcw, "fcb": fcb}


@jax.jit
def equation_classifier_forward(tokens, prepared):
    """tokens: (B, T) int32 in [0, 16). Returns (B, 2) float32 logits."""
    B, T = tokens.shape
    tok_flat = tokens.reshape(B * T).astype(jnp.int32)
    kernel = functools.partial(lstm_fc_kernel, B=B, T=T)

    # NOTE: at this toy B the whole problem is latency-bound (<0.5 MiB total);
    # if B grows, add a parallel batch grid so v7x's two TensorCores split work.
    out_pad = pl.pallas_call(
        kernel,
        out_shape=jax.ShapeDtypeStruct((B, OUT_PAD), jnp.float32),
        in_specs=[
            pl.BlockSpec(memory_space=pltpu.MemorySpace.SMEM),  # tokens (flat)
            pl.BlockSpec(memory_space=pltpu.MemorySpace.VMEM),  # gx_table
            pl.BlockSpec(memory_space=pltpu.MemorySpace.VMEM),  # W_hh^T (bf16, padded)
            pl.BlockSpec(memory_space=pltpu.MemorySpace.VMEM),  # fc_w^T (padded)
            pl.BlockSpec(memory_space=pltpu.MemorySpace.VMEM),  # fc_b (padded)
        ],
        out_specs=pl.BlockSpec(memory_space=pltpu.MemorySpace.VMEM),
    )(tok_flat, prepared["gx_table"], prepared["whh"],
      prepared["fcw"], prepared["fcb"])
    return out_pad[:, :2]


def init_params(key, hidden_size):
    """Deterministic synthetic parameters matching the PyTorch module shapes."""
    ks = jax.random.split(key, 7)
    H = hidden_size
    scale = 0.1
    return {
        "embedding": scale * jax.random.normal(ks[0], (VOCAB, H), jnp.float32),
        "w_ih": scale * jax.random.normal(ks[1], (4 * H, H), jnp.float32),
        "w_hh": scale * jax.random.normal(ks[2], (4 * H, H), jnp.float32),
        "b_ih": scale * jax.random.normal(ks[3], (4 * H,), jnp.float32),
        "b_hh": scale * jax.random.normal(ks[4], (4 * H,), jnp.float32),
        "fc_w": scale * jax.random.normal(ks[5], (2, H), jnp.float32),
        "fc_b": scale * jax.random.normal(ks[6], (2,), jnp.float32),
    }


def _reference_forward(tokens, params):
    """Pure-JAX f32 reference (PyTorch LSTM semantics) for sanity checking."""
    hp = lax.Precision.HIGHEST
    emb = params["embedding"][tokens]         # (B, T, H)
    B, T, H = emb.shape
    wih_t = params["w_ih"].T
    whh_t = params["w_hh"].T
    bias = params["b_ih"] + params["b_hh"]

    def step(carry, x_t):
        h, c = carry
        gates = (jnp.dot(x_t, wih_t, precision=hp)
                 + jnp.dot(h, whh_t, precision=hp) + bias)
        i = jax.nn.sigmoid(gates[:, 0 * H:1 * H])
        f = jax.nn.sigmoid(gates[:, 1 * H:2 * H])
        g = jnp.tanh(gates[:, 2 * H:3 * H])
        o = jax.nn.sigmoid(gates[:, 3 * H:4 * H])
        c = f * c + i * g
        h = o * jnp.tanh(c)
        return (h, c), None

    h0 = jnp.zeros((B, H), jnp.float32)
    c0 = jnp.zeros((B, H), jnp.float32)
    (h_last, _), _ = lax.scan(step, (h0, c0), jnp.transpose(emb, (1, 0, 2)))
    return jnp.dot(h_last, params["fc_w"].T, precision=hp) + params["fc_b"]


if __name__ == "__main__":
    key = jax.random.PRNGKey(0)
    k_tok, k_par = jax.random.split(key)

    B, T, H = 2, 8, 32
    tokens = jax.random.randint(k_tok, (B, T), 0, VOCAB, dtype=jnp.int32)
    params = init_params(k_par, H)

    # Hoisted, one-time parameter preprocessing (not part of the per-call path).
    prepared = prepare_params(params)
    prepared = jax.tree_util.tree_map(jax.block_until_ready, prepared)

    out = equation_classifier_forward(tokens, prepared)
    out = jax.block_until_ready(out)

    ref = _reference_forward(tokens, params)
    assert out.shape == (B, 2)
    # bf16 recurrent matmul inputs -> relaxed tolerance vs. the f32 reference.
    assert jnp.allclose(out, ref, atol=5e-2, rtol=5e-2)

    print("KERNEL_OK")
</pallas_src>

<mosaic_0001>
module attributes {stable_mosaic.version = 11 : i64} {
  func.func @lstm_fc_kernel(%arg0: memref<16xi32, #tpu.memory_space<smem>>, %arg1: memref<16x1x512xf32, #tpu.memory_space<vmem>>, %arg2: memref<128x512xbf16, #tpu.memory_space<vmem>>, %arg3: memref<128x128xf32, #tpu.memory_space<vmem>>, %arg4: memref<1x128xf32, #tpu.memory_space<vmem>>, %arg5: memref<2x128xf32, #tpu.memory_space<vmem>>) attributes {dimension_semantics = [], scalar_prefetch = 0 : i64, scratch_operands = 0 : i64, tpu.core_type = #tpu.core_type<tc>} {
    %cst = arith.constant 0.000000e+00 : f32
    %0 = vector.broadcast %cst : f32 to vector<2x128xf32>
    %cst_0 = arith.constant 0.000000e+00 : f32
    %1 = vector.broadcast %cst_0 : f32 to vector<2x128xf32>
    %c0_i32 = arith.constant 0 : i32
    %c0_i32_1 = arith.constant 0 : i32
    %2 = arith.addi %c0_i32_1, %c0_i32 : i32
    %3 = arith.index_cast %2 : i32 to index
    %4 = memref.load %arg0[%3] : memref<16xi32, #tpu.memory_space<smem>>
    %5 = arith.index_cast %4 : i32 to index
    %c0 = arith.constant 0 : index
    %c0_2 = arith.constant 0 : index
    %6 = vector.load %arg1[%5, %c0, %c0_2] : memref<16x1x512xf32, #tpu.memory_space<vmem>>, vector<1x1x512xf32>
    %7 = vector.shape_cast %6 : vector<1x1x512xf32> to vector<1x512xf32>
    %c8_i32 = arith.constant 8 : i32
    %8 = arith.addi %c8_i32, %c0_i32 : i32
    %9 = arith.index_cast %8 : i32 to index
    %10 = memref.load %arg0[%9] : memref<16xi32, #tpu.memory_space<smem>>
    %11 = arith.index_cast %10 : i32 to index
    %c0_3 = arith.constant 0 : index
    %c0_4 = arith.constant 0 : index
    %12 = vector.load %arg1[%11, %c0_3, %c0_4] : memref<16x1x512xf32, #tpu.memory_space<vmem>>, vector<1x1x512xf32>
    %13 = vector.shape_cast %12 : vector<1x1x512xf32> to vector<1x512xf32>
    %14 = tpu.concatenate %7, %13 in 0 : vector<1x512xf32>, vector<1x512xf32> -> vector<2x512xf32>
    %15 = arith.truncf %0 : vector<2x128xf32> to vector<2x128xbf16>
    %c0_5 = arith.constant 0 : index
    %c0_6 = arith.constant 0 : index
    %16 = vector.load %arg2[%c0_5, %c0_6] : memref<128x512xbf16, #tpu.memory_space<vmem>>, vector<128x512xbf16>
    %cst_7 = arith.constant dense<0.000000e+00> : vector<2x512xf32>
    %17 = tpu.matmul %15, %16, %cst_7 {dimension_numbers = #tpu.dot_dimension_numbers<[1], [0], [0], [1], [0, 0, 1, 1], [], []>} : vector<2x128xbf16>, vector<128x512xbf16>, vector<2x512xf32> -> vector<2x512xf32>
    %18 = arith.addf %14, %17 : vector<2x512xf32>
    %19 = vector.extract_strided_slice %18 {offsets = [0, 0], sizes = [2, 384], strides = [1, 1]} : vector<2x512xf32> to vector<2x384xf32>
    %20 = arith.negf %19 : vector<2x384xf32>
    %21 = math.exp %20 : vector<2x384xf32>
    %cst_8 = arith.constant 1.000000e+00 : f32
    %22 = vector.broadcast %cst_8 : f32 to vector<2x384xf32>
    %23 = arith.addf %22, %21 : vector<2x384xf32>
    %24 = arith.divf %22, %23 : vector<2x384xf32>
    %25 = vector.extract_strided_slice %24 {offsets = [0, 0], sizes = [2, 128], strides = [1, 1]} : vector<2x384xf32> to vector<2x128xf32>
    %26 = vector.extract_strided_slice %24 {offsets = [0, 128], sizes = [2, 128], strides = [1, 1]} : vector<2x384xf32> to vector<2x128xf32>
    %27 = vector.extract_strided_slice %24 {offsets = [0, 256], sizes = [2, 128], strides = [1, 1]} : vector<2x384xf32> to vector<2x128xf32>
    %28 = vector.extract_strided_slice %18 {offsets = [0, 384], sizes = [2, 128], strides = [1, 1]} : vector<2x512xf32> to vector<2x128xf32>
    %29 = math.tanh %28 : vector<2x128xf32>
    %30 = arith.mulf %26, %1 : vector<2x128xf32>
    %31 = arith.mulf %25, %29 : vector<2x128xf32>
    %32 = arith.addf %30, %31 : vector<2x128xf32>
    %33 = math.tanh %32 : vector<2x128xf32>
    %34 = arith.mulf %27, %33 : vector<2x128xf32>
    %c1_i32 = arith.constant 1 : i32
    %c0_i32_9 = arith.constant 0 : i32
    %35 = arith.addi %c0_i32_9, %c1_i32 : i32
    %36 = arith.index_cast %35 : i32 to index
    %37 = memref.load %arg0[%36] : memref<16xi32, #tpu.memory_space<smem>>
    %38 = arith.index_cast %37 : i32 to index
    %c0_10 = arith.constant 0 : index
    %c0_11 = arith.constant 0 : index
    %39 = vector.load %arg1[%38, %c0_10, %c0_11] : memref<16x1x512xf32, #tpu.memory_space<vmem>>, vector<1x1x512xf32>
    %40 = vector.shape_cast %39 : vector<1x1x512xf32> to vector<1x512xf32>
    %c8_i32_12 = arith.constant 8 : i32
    %41 = arith.addi %c8_i32_12, %c1_i32 : i32
    %42 = arith.index_cast %41 : i32 to index
    %43 = memref.load %arg0[%42] : memref<16xi32, #tpu.memory_space<smem>>
    %44 = arith.index_cast %43 : i32 to index
    %c0_13 = arith.constant 0 : index
    %c0_14 = arith.constant 0 : index
    %45 = vector.load %arg1[%44, %c0_13, %c0_14] : memref<16x1x512xf32, #tpu.memory_space<vmem>>, vector<1x1x512xf32>
    %46 = vector.shape_cast %45 : vector<1x1x512xf32> to vector<1x512xf32>
    %47 = tpu.concatenate %40, %46 in 0 : vector<1x512xf32>, vector<1x512xf32> -> vector<2x512xf32>
    %48 = arith.truncf %34 : vector<2x128xf32> to vector<2x128xbf16>
    %c0_15 = arith.constant 0 : index
    %c0_16 = arith.constant 0 : index
    %49 = vector.load %arg2[%c0_15, %c0_16] : memref<128x512xbf16, #tpu.memory_space<vmem>>, vector<128x512xbf16>
    %cst_17 = arith.constant dense<0.000000e+00> : vector<2x512xf32>
    %50 = tpu.matmul %48, %49, %cst_17 {dimension_numbers = #tpu.dot_dimension_numbers<[1], [0], [0], [1], [0, 0, 1, 1], [], []>} : vector<2x128xbf16>, vector<128x512xbf16>, vector<2x512xf32> -> vector<2x512xf32>
    %51 = arith.addf %47, %50 : vector<2x512xf32>
    %52 = vector.extract_strided_slice %51 {offsets = [0, 0], sizes = [2, 384], strides = [1, 1]} : vector<2x512xf32> to vector<2x384xf32>
    %53 = arith.negf %52 : vector<2x384xf32>
    %54 = math.exp %53 : vector<2x384xf32>
    %cst_18 = arith.constant 1.000000e+00 : f32
    %55 = vector.broadcast %cst_18 : f32 to vector<2x384xf32>
    %56 = arith.addf %55, %54 : vector<2x384xf32>
    %57 = arith.divf %55, %56 : vector<2x384xf32>
    %58 = vector.extract_strided_slice %57 {offsets = [0, 0], sizes = [2, 128], strides = [1, 1]} : vector<2x384xf32> to vector<2x128xf32>
    %59 = vector.extract_strided_slice %57 {offsets = [0, 128], sizes = [2, 128], strides = [1, 1]} : vector<2x384xf32> to vector<2x128xf32>
    %60 = vector.extract_strided_slice %57 {offsets = [0, 256], sizes = [2, 128], strides = [1, 1]} : vector<2x384xf32> to vector<2x128xf32>
    %61 = vector.extract_strided_slice %51 {offsets = [0, 384], sizes = [2, 128], strides = [1, 1]} : vector<2x512xf32> to vector<2x128xf32>
    %62 = math.tanh %61 : vector<2x128xf32>
    %63 = arith.mulf %59, %32 : vector<2x128xf32>
    %64 = arith.mulf %58, %62 : vector<2x128xf32>
    %65 = arith.addf %63, %64 : vector<2x128xf32>
    %66 = math.tanh %65 : vector<2x128xf32>
    %67 = arith.mulf %60, %66 : vector<2x128xf32>
    %c2_i32 = arith.constant 2 : i32
    %c0_i32_19 = arith.constant 0 : i32
    %68 = arith.addi %c0_i32_19, %c2_i32 : i32
    %69 = arith.index_cast %68 : i32 to index
    %70 = memref.load %arg0[%69] : memref<16xi32, #tpu.memory_space<smem>>
    %71 = arith.index_cast %70 : i32 to index
    %c0_20 = arith.constant 0 : index
    %c0_21 = arith.constant 0 : index
    %72 = vector.load %arg1[%71, %c0_20, %c0_21] : memref<16x1x512xf32, #tpu.memory_space<vmem>>, vector<1x1x512xf32>
    %73 = vector.shape_cast %72 : vector<1x1x512xf32> to vector<1x512xf32>
    %c8_i32_22 = arith.constant 8 : i32
    %74 = arith.addi %c8_i32_22, %c2_i32 : i32
    %75 = arith.index_cast %74 : i32 to index
    %76 = memref.load %arg0[%75] : memref<16xi32, #tpu.memory_space<smem>>
    %77 = arith.index_cast %76 : i32 to index
    %c0_23 = arith.constant 0 : index
    %c0_24 = arith.constant 0 : index
    %78 = vector.load %arg1[%77, %c0_23, %c0_24] : memref<16x1x512xf32, #tpu.memory_space<vmem>>, vector<1x1x512xf32>
    %79 = vector.shape_cast %78 : vector<1x1x512xf32> to vector<1x512xf32>
    %80 = tpu.concatenate %73, %79 in 0 : vector<1x512xf32>, vector<1x512xf32> -> vector<2x512xf32>
    %81 = arith.truncf %67 : vector<2x128xf32> to vector<2x128xbf16>
    %c0_25 = arith.constant 0 : index
    %c0_26 = arith.constant 0 : index
    %82 = vector.load %arg2[%c0_25, %c0_26] : memref<128x512xbf16, #tpu.memory_space<vmem>>, vector<128x512xbf16>
    %cst_27 = arith.constant dense<0.000000e+00> : vector<2x512xf32>
    %83 = tpu.matmul %81, %82, %cst_27 {dimension_numbers = #tpu.dot_dimension_numbers<[1], [0], [0], [1], [0, 0, 1, 1], [], []>} : vector<2x128xbf16>, vector<128x512xbf16>, vector<2x512xf32> -> vector<2x512xf32>
    %84 = arith.addf %80, %83 : vector<2x512xf32>
    %85 = vector.extract_strided_slice %84 {offsets = [0, 0], sizes = [2, 384], strides = [1, 1]} : vector<2x512xf32> to vector<2x384xf32>
    %86 = arith.negf %85 : vector<2x384xf32>
    %87 = math.exp %86 : vector<2x384xf32>
    %cst_28 = arith.constant 1.000000e+00 : f32
    %88 = vector.broadcast %cst_28 : f32 to vector<2x384xf32>
    %89 = arith.addf %88, %87 : vector<2x384xf32>
    %90 = arith.divf %88, %89 : vector<2x384xf32>
    %91 = vector.extract_strided_slice %90 {offsets = [0, 0], sizes = [2, 128], strides = [1, 1]} : vector<2x384xf32> to vector<2x128xf32>
    %92 = vector.extract_strided_slice %90 {offsets = [0, 128], sizes = [2, 128], strides = [1, 1]} : vector<2x384xf32> to vector<2x128xf32>
    %93 = vector.extract_strided_slice %90 {offsets = [0, 256], sizes = [2, 128], strides = [1, 1]} : vector<2x384xf32> to vector<2x128xf32>
    %94 = vector.extract_strided_slice %84 {offsets = [0, 384], sizes = [2, 128], strides = [1, 1]} : vector<2x512xf32> to vector<2x128xf32>
    %95 = math.tanh %94 : vector<2x128xf32>
    %96 = arith.mulf %92, %65 : vector<2x128xf32>
    %97 = arith.mulf %91, %95 : vector<2x128xf32>
    %98 = arith.addf %96, %97 : vector<2x128xf32>
    %99 = math.tanh %98 : vector<2x128xf32>
    %100 = arith.mulf %93, %99 : vector<2x128xf32>
    %c3_i32 = arith.constant 3 : i32
    %c0_i32_29 = arith.constant 0 : i32
    %101 = arith.addi %c0_i32_29, %c3_i32 : i32
    %102 = arith.index_cast %101 : i32 to index
    %103 = memref.load %arg0[%102] : memref<16xi32, #tpu.memory_space<smem>>
    %104 = arith.index_cast %103 : i32 to index
    %c0_30 = arith.constant 0 : index
    %c0_31 = arith.constant 0 : index
    %105 = vector.load %arg1[%104, %c0_30, %c0_31] : memref<16x1x512xf32, #tpu.memory_space<vmem>>, vector<1x1x512xf32>
    %106 = vector.shape_cast %105 : vector<1x1x512xf32> to vector<1x512xf32>
    %c8_i32_32 = arith.constant 8 : i32
    %107 = arith.addi %c8_i32_32, %c3_i32 : i32
    %108 = arith.index_cast %107 : i32 to index
    %109 = memref.load %arg0[%108] : memref<16xi32, #tpu.memory_space<smem>>
    %110 = arith.index_cast %109 : i32 to index
    %c0_33 = arith.constant 0 : index
    %c0_34 = arith.constant 0 : index
    %111 = vector.load %arg1[%110, %c0_33, %c0_34] : memref<16x1x512xf32, #tpu.memory_space<vmem>>, vector<1x1x512xf32>
    %112 = vector.shape_cast %111 : vector<1x1x512xf32> to vector<1x512xf32>
    %113 = tpu.concatenate %106, %112 in 0 : vector<1x512xf32>, vector<1x512xf32> -> vector<2x512xf32>
    %114 = arith.truncf %100 : vector<2x128xf32> to vector<2x128xbf16>
    %c0_35 = arith.constant 0 : index
    %c0_36 = arith.constant 0 : index
    %115 = vector.load %arg2[%c0_35, %c0_36] : memref<128x512xbf16, #tpu.memory_space<vmem>>, vector<128x512xbf16>
    %cst_37 = arith.constant dense<0.000000e+00> : vector<2x512xf32>
    %116 = tpu.matmul %114, %115, %cst_37 {dimension_numbers = #tpu.dot_dimension_numbers<[1], [0], [0], [1], [0, 0, 1, 1], [], []>} : vector<2x128xbf16>, vector<128x512xbf16>, vector<2x512xf32> -> vector<2x512xf32>
    %117 = arith.addf %113, %116 : vector<2x512xf32>
    %118 = vector.extract_strided_slice %117 {offsets = [0, 0], sizes = [2, 384], strides = [1, 1]} : vector<2x512xf32> to vector<2x384xf32>
    %119 = arith.negf %118 : vector<2x384xf32>
    %120 = math.exp %119 : vector<2x384xf32>
    %cst_38 = arith.constant 1.000000e+00 : f32
    %121 = vector.broadcast %cst_38 : f32 to vector<2x384xf32>
    %122 = arith.addf %121, %120 : vector<2x384xf32>
    %123 = arith.divf %121, %122 : vector<2x384xf32>
    %124 = vector.extract_strided_slice %123 {offsets = [0, 0], sizes = [2, 128], strides = [1, 1]} : vector<2x384xf32> to vector<2x128xf32>
    %125 = vector.extract_strided_slice %123 {offsets = [0, 128], sizes = [2, 128], strides = [1, 1]} : vector<2x384xf32> to vector<2x128xf32>
    %126 = vector.extract_strided_slice %123 {offsets = [0, 256], sizes = [2, 128], strides = [1, 1]} : vector<2x384xf32> to vector<2x128xf32>
    %127 = vector.extract_strided_slice %117 {offsets = [0, 384], sizes = [2, 128], strides = [1, 1]} : vector<2x512xf32> to vector<2x128xf32>
    %128 = math.tanh %127 : vector<2x128xf32>
    %129 = arith.mulf %125, %98 : vector<2x128xf32>
    %130 = arith.mulf %124, %128 : vector<2x128xf32>
    %131 = arith.addf %129, %130 : vector<2x128xf32>
    %132 = math.tanh %131 : vector<2x128xf32>
    %133 = arith.mulf %126, %132 : vector<2x128xf32>
    %c4_i32 = arith.constant 4 : i32
    %c0_i32_39 = arith.constant 0 : i32
    %134 = arith.addi %c0_i32_39, %c4_i32 : i32
    %135 = arith.index_cast %134 : i32 to index
    %136 = memref.load %arg0[%135] : memref<16xi32, #tpu.memory_space<smem>>
    %137 = arith.index_cast %136 : i32 to index
    %c0_40 = arith.constant 0 : index
    %c0_41 = arith.constant 0 : index
    %138 = vector.load %arg1[%137, %c0_40, %c0_41] : memref<16x1x512xf32, #tpu.memory_space<vmem>>, vector<1x1x512xf32>
    %139 = vector.shape_cast %138 : vector<1x1x512xf32> to vector<1x512xf32>
    %c8_i32_42 = arith.constant 8 : i32
    %140 = arith.addi %c8_i32_42, %c4_i32 : i32
    %141 = arith.index_cast %140 : i32 to index
    %142 = memref.load %arg0[%141] : memref<16xi32, #tpu.memory_space<smem>>
    %143 = arith.index_cast %142 : i32 to index
    %c0_43 = arith.constant 0 : index
    %c0_44 = arith.constant 0 : index
    %144 = vector.load %arg1[%143, %c0_43, %c0_44] : memref<16x1x512xf32, #tpu.memory_space<vmem>>, vector<1x1x512xf32>
    %145 = vector.shape_cast %144 : vector<1x1x512xf32> to vector<1x512xf32>
    %146 = tpu.concatenate %139, %145 in 0 : vector<1x512xf32>, vector<1x512xf32> -> vector<2x512xf32>
    %147 = arith.truncf %133 : vector<2x128xf32> to vector<2x128xbf16>
    %c0_45 = arith.constant 0 : index
    %c0_46 = arith.constant 0 : index
    %148 = vector.load %arg2[%c0_45, %c0_46] : memref<128x512xbf16, #tpu.memory_space<vmem>>, vector<128x512xbf16>
    %cst_47 = arith.constant dense<0.000000e+00> : vector<2x512xf32>
    %149 = tpu.matmul %147, %148, %cst_47 {dimension_numbers = #tpu.dot_dimension_numbers<[1], [0], [0], [1], [0, 0, 1, 1], [], []>} : vector<2x128xbf16>, vector<128x512xbf16>, vector<2x512xf32> -> vector<2x512xf32>
    %150 = arith.addf %146, %149 : vector<2x512xf32>
    %151 = vector.extract_strided_slice %150 {offsets = [0, 0], sizes = [2, 384], strides = [1, 1]} : vector<2x512xf32> to vector<2x384xf32>
    %152 = arith.negf %151 : vector<2x384xf32>
    %153 = math.exp %152 : vector<2x384xf32>
    %cst_48 = arith.constant 1.000000e+00 : f32
    %154 = vector.broadcast %cst_48 : f32 to vector<2x384xf32>
    %155 = arith.addf %154, %153 : vector<2x384xf32>
    %156 = arith.divf %154, %155 : vector<2x384xf32>
    %157 = vector.extract_strided_slice %156 {offsets = [0, 0], sizes = [2, 128], strides = [1, 1]} : vector<2x384xf32> to vector<2x128xf32>
    %158 = vector.extract_strided_slice %156 {offsets = [0, 128], sizes = [2, 128], strides = [1, 1]} : vector<2x384xf32> to vector<2x128xf32>
    %159 = vector.extract_strided_slice %156 {offsets = [0, 256], sizes = [2, 128], strides = [1, 1]} : vector<2x384xf32> to vector<2x128xf32>
    %160 = vector.extract_strided_slice %150 {offsets = [0, 384], sizes = [2, 128], strides = [1, 1]} : vector<2x512xf32> to vector<2x128xf32>
    %161 = math.tanh %160 : vector<2x128xf32>
    %162 = arith.mulf %158, %131 : vector<2x128xf32>
    %163 = arith.mulf %157, %161 : vector<2x128xf32>
    %164 = arith.addf %162, %163 : vector<2x128xf32>
    %165 = math.tanh %164 : vector<2x128xf32>
    %166 = arith.mulf %159, %165 : vector<2x128xf32>
    %c5_i32 = arith.constant 5 : i32
    %c0_i32_49 = arith.constant 0 : i32
    %167 = arith.addi %c0_i32_49, %c5_i32 : i32
    %168 = arith.index_cast %167 : i32 to index
    %169 = memref.load %arg0[%168] : memref<16xi32, #tpu.memory_space<smem>>
    %170 = arith.index_cast %169 : i32 to index
    %c0_50 = arith.constant 0 : index
    %c0_51 = arith.constant 0 : index
    %171 = vector.load %arg1[%170, %c0_50, %c0_51] : memref<16x1x512xf32, #tpu.memory_space<vmem>>, vector<1x1x512xf32>
    %172 = vector.shape_cast %171 : vector<1x1x512xf32> to vector<1x512xf32>
    %c8_i32_52 = arith.constant 8 : i32
    %173 = arith.addi %c8_i32_52, %c5_i32 : i32
    %174 = arith.index_cast %173 : i32 to index
    %175 = memref.load %arg0[%174] : memref<16xi32, #tpu.memory_space<smem>>
    %176 = arith.index_cast %175 : i32 to index
    %c0_53 = arith.constant 0 : index
    %c0_54 = arith.constant 0 : index
    %177 = vector.load %arg1[%176, %c0_53, %c0_54] : memref<16x1x512xf32, #tpu.memory_space<vmem>>, vector<1x1x512xf32>
    %178 = vector.shape_cast %177 : vector<1x1x512xf32> to vector<1x512xf32>
    %179 = tpu.concatenate %172, %178 in 0 : vector<1x512xf32>, vector<1x512xf32> -> vector<2x512xf32>
    %180 = arith.truncf %166 : vector<2x128xf32> to vector<2x128xbf16>
    %c0_55 = arith.constant 0 : index
    %c0_56 = arith.constant 0 : index
    %181 = vector.load %arg2[%c0_55, %c0_56] : memref<128x512xbf16, #tpu.memory_space<vmem>>, vector<128x512xbf16>
    %cst_57 = arith.constant dense<0.000000e+00> : vector<2x512xf32>
    %182 = tpu.matmul %180, %181, %cst_57 {dimension_numbers = #tpu.dot_dimension_numbers<[1], [0], [0], [1], [0, 0, 1, 1], [], []>} : vector<2x128xbf16>, vector<128x512xbf16>, vector<2x512xf32> -> vector<2x512xf32>
    %183 = arith.addf %179, %182 : vector<2x512xf32>
    %184 = vector.extract_strided_slice %183 {offsets = [0, 0], sizes = [2, 384], strides = [1, 1]} : vector<2x512xf32> to vector<2x384xf32>
    %185 = arith.negf %184 : vector<2x384xf32>
    %186 = math.exp %185 : vector<2x384xf32>
    %cst_58 = arith.constant 1.000000e+00 : f32
    %187 = vector.broadcast %cst_58 : f32 to vector<2x384xf32>
    %188 = arith.addf %187, %186 : vector<2x384xf32>
    %189 = arith.divf %187, %188 : vector<2x384xf32>
    %190 = vector.extract_strided_slice %189 {offsets = [0, 0], sizes = [2, 128], strides = [1, 1]} : vector<2x384xf32> to vector<2x128xf32>
    %191 = vector.extract_strided_slice %189 {offsets = [0, 128], sizes = [2, 128], strides = [1, 1]} : vector<2x384xf32> to vector<2x128xf32>
    %192 = vector.extract_strided_slice %189 {offsets = [0, 256], sizes = [2, 128], strides = [1, 1]} : vector<2x384xf32> to vector<2x128xf32>
    %193 = vector.extract_strided_slice %183 {offsets = [0, 384], sizes = [2, 128], strides = [1, 1]} : vector<2x512xf32> to vector<2x128xf32>
    %194 = math.tanh %193 : vector<2x128xf32>
    %195 = arith.mulf %191, %164 : vector<2x128xf32>
    %196 = arith.mulf %190, %194 : vector<2x128xf32>
    %197 = arith.addf %195, %196 : vector<2x128xf32>
    %198 = math.tanh %197 : vector<2x128xf32>
    %199 = arith.mulf %192, %198 : vector<2x128xf32>
    %c6_i32 = arith.constant 6 : i32
    %c0_i32_59 = arith.constant 0 : i32
    %200 = arith.addi %c0_i32_59, %c6_i32 : i32
    %201 = arith.index_cast %200 : i32 to index
    %202 = memref.load %arg0[%201] : memref<16xi32, #tpu.memory_space<smem>>
    %203 = arith.index_cast %202 : i32 to index
    %c0_60 = arith.constant 0 : index
    %c0_61 = arith.constant 0 : index
    %204 = vector.load %arg1[%203, %c0_60, %c0_61] : memref<16x1x512xf32, #tpu.memory_space<vmem>>, vector<1x1x512xf32>
    %205 = vector.shape_cast %204 : vector<1x1x512xf32> to vector<1x512xf32>
    %c8_i32_62 = arith.constant 8 : i32
    %206 = arith.addi %c8_i32_62, %c6_i32 : i32
    %207 = arith.index_cast %206 : i32 to index
    %208 = memref.load %arg0[%207] : memref<16xi32, #tpu.memory_space<smem>>
    %209 = arith.index_cast %208 : i32 to index
    %c0_63 = arith.constant 0 : index
    %c0_64 = arith.constant 0 : index
    %210 = vector.load %arg1[%209, %c0_63, %c0_64] : memref<16x1x512xf32, #tpu.memory_space<vmem>>, vector<1x1x512xf32>
    %211 = vector.shape_cast %210 : vector<1x1x512xf32> to vector<1x512xf32>
    %212 = tpu.concatenate %205, %211 in 0 : vector<1x512xf32>, vector<1x512xf32> -> vector<2x512xf32>
    %213 = arith.truncf %199 : vector<2x128xf32> to vector<2x128xbf16>
    %c0_65 = arith.constant 0 : index
    %c0_66 = arith.constant 0 : index
    %214 = vector.load %arg2[%c0_65, %c0_66] : memref<128x512xbf16, #tpu.memory_space<vmem>>, vector<128x512xbf16>
    %cst_67 = arith.constant dense<0.000000e+00> : vector<2x512xf32>
    %215 = tpu.matmul %213, %214, %cst_67 {dimension_numbers = #tpu.dot_dimension_numbers<[1], [0], [0], [1], [0, 0, 1, 1], [], []>} : vector<2x128xbf16>, vector<128x512xbf16>, vector<2x512xf32> -> vector<2x512xf32>
    %216 = arith.addf %212, %215 : vector<2x512xf32>
    %217 = vector.extract_strided_slice %216 {offsets = [0, 0], sizes = [2, 384], strides = [1, 1]} : vector<2x512xf32> to vector<2x384xf32>
    %218 = arith.negf %217 : vector<2x384xf32>
    %219 = math.exp %218 : vector<2x384xf32>
    %cst_68 = arith.constant 1.000000e+00 : f32
    %220 = vector.broadcast %cst_68 : f32 to vector<2x384xf32>
    %221 = arith.addf %220, %219 : vector<2x384xf32>
    %222 = arith.divf %220, %221 : vector<2x384xf32>
    %223 = vector.extract_strided_slice %222 {offsets = [0, 0], sizes = [2, 128], strides = [1, 1]} : vector<2x384xf32> to vector<2x128xf32>
    %224 = vector.extract_strided_slice %222 {offsets = [0, 128], sizes = [2, 128], strides = [1, 1]} : vector<2x384xf32> to vector<2x128xf32>
    %225 = vector.extract_strided_slice %222 {offsets = [0, 256], sizes = [2, 128], strides = [1, 1]} : vector<2x384xf32> to vector<2x128xf32>
    %226 = vector.extract_strided_slice %216 {offsets = [0, 384], sizes = [2, 128], strides = [1, 1]} : vector<2x512xf32> to vector<2x128xf32>
    %227 = math.tanh %226 : vector<2x128xf32>
    %228 = arith.mulf %224, %197 : vector<2x128xf32>
    %229 = arith.mulf %223, %227 : vector<2x128xf32>
    %230 = arith.addf %228, %229 : vector<2x128xf32>
    %231 = math.tanh %230 : vector<2x128xf32>
    %232 = arith.mulf %225, %231 : vector<2x128xf32>
    %c7_i32 = arith.constant 7 : i32
    %c0_i32_69 = arith.constant 0 : i32
    %233 = arith.addi %c0_i32_69, %c7_i32 : i32
    %234 = arith.index_cast %233 : i32 to index
    %235 = memref.load %arg0[%234] : memref<16xi32, #tpu.memory_space<smem>>
    %236 = arith.index_cast %235 : i32 to index
    %c0_70 = arith.constant 0 : index
    %c0_71 = arith.constant 0 : index
    %237 = vector.load %arg1[%236, %c0_70, %c0_71] : memref<16x1x512xf32, #tpu.memory_space<vmem>>, vector<1x1x512xf32>
    %238 = vector.shape_cast %237 : vector<1x1x512xf32> to vector<1x512xf32>
    %c8_i32_72 = arith.constant 8 : i32
    %239 = arith.addi %c8_i32_72, %c7_i32 : i32
    %240 = arith.index_cast %239 : i32 to index
    %241 = memref.load %arg0[%240] : memref<16xi32, #tpu.memory_space<smem>>
    %242 = arith.index_cast %241 : i32 to index
    %c0_73 = arith.constant 0 : index
    %c0_74 = arith.constant 0 : index
    %243 = vector.load %arg1[%242, %c0_73, %c0_74] : memref<16x1x512xf32, #tpu.memory_space<vmem>>, vector<1x1x512xf32>
    %244 = vector.shape_cast %243 : vector<1x1x512xf32> to vector<1x512xf32>
    %245 = tpu.concatenate %238, %244 in 0 : vector<1x512xf32>, vector<1x512xf32> -> vector<2x512xf32>
    %246 = arith.truncf %232 : vector<2x128xf32> to vector<2x128xbf16>
    %c0_75 = arith.constant 0 : index
    %c0_76 = arith.constant 0 : index
    %247 = vector.load %arg2[%c0_75, %c0_76] : memref<128x512xbf16, #tpu.memory_space<vmem>>, vector<128x512xbf16>
    %cst_77 = arith.constant dense<0.000000e+00> : vector<2x512xf32>
    %248 = tpu.matmul %246, %247, %cst_77 {dimension_numbers = #tpu.dot_dimension_numbers<[1], [0], [0], [1], [0, 0, 1, 1], [], []>} : vector<2x128xbf16>, vector<128x512xbf16>, vector<2x512xf32> -> vector<2x512xf32>
    %249 = arith.addf %245, %248 : vector<2x512xf32>
    %250 = vector.extract_strided_slice %249 {offsets = [0, 0], sizes = [2, 384], strides = [1, 1]} : vector<2x512xf32> to vector<2x384xf32>
    %251 = arith.negf %250 : vector<2x384xf32>
    %252 = math.exp %251 : vector<2x384xf32>
    %cst_78 = arith.constant 1.000000e+00 : f32
    %253 = vector.broadcast %cst_78 : f32 to vector<2x384xf32>
    %254 = arith.addf %253, %252 : vector<2x384xf32>
    %255 = arith.divf %253, %254 : vector<2x384xf32>
    %256 = vector.extract_strided_slice %255 {offsets = [0, 0], sizes = [2, 128], strides = [1, 1]} : vector<2x384xf32> to vector<2x128xf32>
    %257 = vector.extract_strided_slice %255 {offsets = [0, 128], sizes = [2, 128], strides = [1, 1]} : vector<2x384xf32> to vector<2x128xf32>
    %258 = vector.extract_strided_slice %255 {offsets = [0, 256], sizes = [2, 128], strides = [1, 1]} : vector<2x384xf32> to vector<2x128xf32>
    %259 = vector.extract_strided_slice %249 {offsets = [0, 384], sizes = [2, 128], strides = [1, 1]} : vector<2x512xf32> to vector<2x128xf32>
    %260 = math.tanh %259 : vector<2x128xf32>
    %261 = arith.mulf %257, %230 : vector<2x128xf32>
    %262 = arith.mulf %256, %260 : vector<2x128xf32>
    %263 = arith.addf %261, %262 : vector<2x128xf32>
    %264 = math.tanh %263 : vector<2x128xf32>
    %265 = arith.mulf %258, %264 : vector<2x128xf32>
    %c8_i32_79 = arith.constant 8 : i32
    %c0_80 = arith.constant 0 : index
    %c0_81 = arith.constant 0 : index
    %266 = vector.load %arg3[%c0_80, %c0_81] : memref<128x128xf32, #tpu.memory_space<vmem>>, vector<128x128xf32>
    %cst_82 = arith.constant dense<0.000000e+00> : vector<2x128xf32>
    %267 = tpu.matmul %265, %266, %cst_82 {dimension_numbers = #tpu.dot_dimension_numbers<[1], [0], [0], [1], [0, 0, 1, 1], [], []>} : vector<2x128xf32>, vector<128x128xf32>, vector<2x128xf32> -> vector<2x128xf32>
    %c0_83 = arith.constant 0 : index
    %c0_84 = arith.constant 0 : index
    %268 = vector.load %arg4[%c0_83, %c0_84] : memref<1x128xf32, #tpu.memory_space<vmem>>, vector<1x128xf32>
    %269 = vector.broadcast %268 : vector<1x128xf32> to vector<2x128xf32>
    %270 = arith.addf %267, %269 : vector<2x128xf32>
    %c0_85 = arith.constant 0 : index
    %c0_86 = arith.constant 0 : index
    %271 = vector.load %arg5[%c0_85, %c0_86] : memref<2x128xf32, #tpu.memory_space<vmem>>, vector<2x128xf32>
    tpu.vector_store %arg5[%c0_85, %c0_86], %270 {strides = array<i32>} : memref<2x128xf32, #tpu.memory_space<vmem>>, vector<2x128xf32>,
    return
  }
}

</mosaic_0001>

<bundles_post_ra>
// kernel: equation_classifier_forward.1
= control target key start
LH: loop header
LB: loop body
LE: loop exit
PB: predicated region body
PF: predicated region fallthrough
CT: control target
= control target key end

     0   :  { %10 = vsyncpa [#allocation5], 0  ;;  %s2856_s0 = inlined_call_operand.vmem [shape: s32[16], index: 0, kind: input, shape index: {}]   ;;  %s2857_s1 = inlined_call_operand.hbm [shape: f32[16,1,512], index: 1, kind: input, shape index: {}]   ;;  %s2858_s2 = inlined_call_operand.hbm [shape: bf16[128,512], index: 2, kind: input, shape index: {}]   ;;  %s2859_s3 = inlined_call_operand.hbm [shape: f32[128,128], index: 3, kind: input, shape index: {}]   ;;  %s2860_s4 = inlined_call_operand.vmem [shape: f32[1,128], index: 4, kind: input, shape index: {}]   ;;  %s2861_s5 = inlined_call_operand.hbm [shape: f32[2,128], index: 5, kind: output, shape index: {}]  }
   0x1   :  { %11 = vsyncpa [#allocation3], 0 }
   0x2   :  { %12 = vsyncpa [#allocation8], 0 }
   0x3   :  { %13 = vsyncpa [#allocation4], 0  ;;  %s2226_s18 = smov [#allocation7]   ;;  %s20_s22 = sshll.u32 %s2856_s0, 4  ;;  %s21_s22 = int_to_ptr.vmem [resolvable:$true] %s20_s22 }
   0x4   :  { %s41_s19 = sshll.u32 %s2226_s18, 4  ;;  %s2118_s25 = scalar_lea.hbm %s2858_s2, 4096  ;;  %s42_s19 = int_to_ptr.vmem [resolvable:$true] %s41_s19 }
   0x5   :  { %p2119_p0 = scmp.ne.s32.totalorder %s2858_s2, %s2118_s25  ;;  %p2122_p1 = scmp.lt.u32.totalorder %s2118_s25, %s2858_s2 }
   0x7   :  { %p2124_p2 = pnand %p2122_p1, %p2119_p0 }
   0x9   :  { %2127 = shalt.err (!%p2124_p2)
}
   0xa   :  { %s2128_s30 = scalar_lea.vmem %s42_s19, 4096  ;;  %p2133_p4 = scmp.lt.s32.totalorder %s42_s19, %s42_s19 }
   0xb   :  { %p2129_p3 = scmp.ne.s32.totalorder %s42_s19, %s2128_s30  ;;  %p2134_p5 = scmp.lt.s32.totalorder %s2128_s30, %s2128_s30 }
   0xd   :  { %p2135_p6 = por %p2134_p5, %p2133_p4 }
   0xf   :  { %p2136_p7 = pnand %p2135_p6, %p2129_p3 }
  0x11   :  { %2139 = shalt.err (!%p2136_p7)
}
  0x12   :  { %s2227_s0 = smov 256   ;;  %s2228_s6 = smov 16  }
  0x13   :  { %47 = dma.hbm_to_vmem [thread:$0]  %s2858_s2, 4096, %s42_s19, [#allocation8], %s2227_s0, %s2227_s0, %s2228_s6  }
  0x14   :  { %s2140_s9 = scalar_lea.vmem %s21_s22, 16  ;;  %p2145_p9 = scmp.lt.s32.totalorder %s21_s22, %s21_s22 }
  0x15   :  { %p2141_p8 = scmp.ne.s32.totalorder %s21_s22, %s2140_s9  ;;  %p2146_p10 = scmp.lt.s32.totalorder %s2140_s9, %s2140_s9 }
  0x17   :  { %p2147_p11 = por %p2146_p10, %p2145_p9 }
  0x19   :  { %p2148_p12 = pnand %p2147_p11, %p2141_p8 }
  0x1b   :  { %2151 = shalt.err (!%p2148_p12)
}
  0x1c   :  { %s2229_s10 = smov [#allocation2]   ;;  %s2230_s11 = smov [#allocation6]  }
  0x1d   :  { %23 = dma.vmem_to_smem %s21_s22, 16, %s2229_s10, [#allocation5]  }
  0x1e   :  { %s29_s12 = sshll.u32 %s2230_s11, 4  ;;  %s2152_s15 = scalar_lea.hbm %s2857_s1, 1024  ;;  %s30_s12 = int_to_ptr.vmem [resolvable:$true] %s29_s12 }
  0x1f   :  { %p2153_p13 = scmp.ne.s32.totalorder %s2857_s1, %s2152_s15  ;;  %p2156_p0 = scmp.lt.u32.totalorder %s2152_s15, %s2857_s1 }
  0x21   :  { %p2158_p1 = pnand %p2156_p0, %p2153_p13 }
  0x23   :  { %2161 = shalt.err (!%p2158_p1)
}
  0x24   :  { %s2162_s19 = scalar_lea.vmem %s30_s12, 1024  ;;  %p2167_p3 = scmp.lt.s32.totalorder %s30_s12, %s30_s12 }
  0x25   :  { %p2163_p2 = scmp.ne.s32.totalorder %s30_s12, %s2162_s19  ;;  %p2168_p4 = scmp.lt.s32.totalorder %s2162_s19, %s2162_s19 }
  0x27   :  { %p2169_p5 = por %p2168_p4, %p2167_p3 }
  0x29   :  { %p2170_p6 = pnand %p2169_p5, %p2163_p2 }
  0x2b   :  { %2173 = shalt.err (!%p2170_p6)
}
  0x2c   :  { %s2231_s20 = smov 64   ;;  %s2232_s21 = smov 4  }
  0x2d   :  { %35 = dma.hbm_to_vmem [thread:$0]  %s2857_s1, 1024, %s30_s12, [#allocation3], %s2231_s20, %s2231_s20, %s2232_s21  }
  0x2e   :  { %s2233_s24 = smov [#allocation9]   ;;  %s2174_s28 = scalar_lea.hbm %s2859_s3, 2048 }
  0x2f   :  { %s53_s25 = sshll.u32 %s2233_s24, 4  ;;  %p2175_p7 = scmp.ne.s32.totalorder %s2859_s3, %s2174_s28  ;;  %s54_s25 = int_to_ptr.vmem [resolvable:$true] %s53_s25 }
  0x30   :  { %p2178_p8 = scmp.lt.u32.totalorder %s2174_s28, %s2859_s3 }
  0x32   :  { %p2180_p9 = pnand %p2178_p8, %p2175_p7 }
  0x34   :  { %2183 = shalt.err (!%p2180_p9)
}
  0x35   :  { %s2184_s7 = scalar_lea.vmem %s54_s25, 2048  ;;  %p2189_p11 = scmp.lt.s32.totalorder %s54_s25, %s54_s25 }
  0x36   :  { %p2185_p10 = scmp.ne.s32.totalorder %s54_s25, %s2184_s7  ;;  %p2190_p12 = scmp.lt.s32.totalorder %s2184_s7, %s2184_s7 }
  0x38   :  { %p2191_p13 = por %p2190_p12, %p2189_p11 }
  0x3a   :  { %p2192_p0 = pnand %p2191_p13, %p2185_p10 }
  0x3c   :  { %2195 = shalt.err (!%p2192_p0)
}
  0x3d   :  { %s2234_s1 = smov 128   ;;  %s2235_s8 = smov 8  }
  0x3e   :  { %59 = dma.hbm_to_vmem [thread:$0]  %s2859_s3, 2048, %s54_s25, [#allocation8], %s2234_s1, %s2234_s1, %s2235_s8  }
  0x3f   :  { %2218 = dma.done.wait [#allocation5], 16  }
  0x40   :  { %2219 = vsyncadd [#allocation5], 4294967280 }
  0x41   :  { %2220 = dma.done.wait [#allocation3], 1024  }
  0x42   :  { %2221 = vsyncadd [#allocation3], 4294966272 }
  0x43   :  { %2222 = dma.done.wait [#allocation8], 6144  }
  0x44   :  { %2223 = vsyncadd [#allocation8], 4294961152 }
  0x45   :  { %74 = sfence }
  0x46   :  { %v2310_v0 = vld [vmem:[#allocation7 + $0x4] ss:$16 sps:$4 sm:$0xff]   ;;  %v2312_v1 = vld [vmem:[#allocation7] ss:$16 sps:$4 sm:$0xff]   ;;  %v2236_v2 = vmov 0   ;;  %s76_s3 = sld [smem:[#allocation2]]  ;;  %v85_v33 = vlaneseq }
  0x47   :  { %355 = vmatprep.mubr.bf16.mxu0 %v2236_v2  ;;  %396 = vmatprep.mubr.bf16.mxu1 %v2236_v2  ;;  %v2317_v3 = vld [vmem:[#allocation7 + $0x24] ss:$16 sps:$4 sm:$0xff]   ;;  %v2320_v4 = vld [vmem:[#allocation7 + $0x20] ss:$16 sps:$4 sm:$0xff]   ;;  %v2325_v6 = vld [vmem:[#allocation7 + $0xc] ss:$16 sps:$4 sm:$0xff]  }
  0x48   :  { %323 = vmatprep.subr.bf16.mxu0 %v2310_v0  ;;  %v2323_v5 = vld [vmem:[#allocation7 + $0x44] ss:$16 sps:$4 sm:$0xff]   ;;  %v2327_v7 = vld [vmem:[#allocation7 + $0x8] ss:$16 sps:$4 sm:$0xff]   ;;  %v2330_v8 = vld [vmem:[#allocation7 + $0x40] ss:$16 sps:$4 sm:$0xff]   ;;  %364 = vmatprep.subr.bf16.mxu1 %v2325_v6 }
  0x49   :  { %324 = vmatpush1.bf16.msra.mxu0 %v2312_v1  ;;  %v2334_v9 = vld [vmem:[#allocation7 + $0x64] ss:$16 sps:$4 sm:$0xff]   ;;  %365 = vmatpush1.bf16.msra.mxu1 %v2327_v7  ;;  %v2337_v10 = vld [vmem:[#allocation7 + $0x2c] ss:$16 sps:$4 sm:$0xff]   ;;  %v2339_v11 = vld [vmem:[#allocation7 + $0x28] ss:$16 sps:$4 sm:$0xff]  }
  0x4a   :  { %325 = vmatprep.subr.bf16.mxu0 %v2317_v3  ;;  %366 = vmatprep.subr.bf16.mxu1 %v2337_v10  ;;  %v2343_v12 = vld [vmem:[#allocation7 + $0x60] ss:$16 sps:$4 sm:$0xff]   ;;  %v2345_v13 = vld [vmem:[#allocation7 + $0x84] ss:$16 sps:$4 sm:$0xff]   ;;  %v2347_v14 = vld [vmem:[#allocation7 + $0x4c] ss:$16 sps:$4 sm:$0xff]  }
  0x4b   :  { %v2351_v15 = vld [vmem:[#allocation7 + $0x48] ss:$16 sps:$4 sm:$0xff]   ;;  %v2354_v16 = vld [vmem:[#allocation7 + $0x6c] ss:$16 sps:$4 sm:$0xff]   ;;  %v2357_v17 = vld [vmem:[#allocation7 + $0x80] ss:$16 sps:$4 sm:$0xff]  }
  0x4c   :  { %v2360_v18 = vld [vmem:[#allocation7 + $0xa4] ss:$16 sps:$4 sm:$0xff]   ;;  %v2363_v19 = vld [vmem:[#allocation7 + $0x68] ss:$16 sps:$4 sm:$0xff]   ;;  %v2366_v20 = vld [vmem:[#allocation7 + $0x8c] ss:$16 sps:$4 sm:$0xff]  }
  0x4d   :  { %326 = vmatpush1.bf16.msra.mxu0 %v2320_v4  ;;  %367 = vmatpush1.bf16.msra.mxu1 %v2339_v11  ;;  %v2369_v21 = vld [vmem:[#allocation7 + $0xa0] ss:$16 sps:$4 sm:$0xff]   ;;  %v2371_v22 = vld [vmem:[#allocation7 + $0xc4] ss:$16 sps:$4 sm:$0xff]   ;;  %v2375_v23 = vld [vmem:[#allocation7 + $0x88] ss:$16 sps:$4 sm:$0xff]  }
  0x4e   :  { %327 = vmatprep.subr.bf16.mxu0 %v2323_v5  ;;  %368 = vmatprep.subr.bf16.mxu1 %v2347_v14  ;;  %v2378_v24 = vld [vmem:[#allocation7 + $0xac] ss:$16 sps:$4 sm:$0xff]   ;;  %v2381_v25 = vld [vmem:[#allocation7 + $0xc0] ss:$16 sps:$4 sm:$0xff]   ;;  %v2384_v26 = vld [vmem:[#allocation7 + $0xe4] ss:$16 sps:$4 sm:$0xff]  }
  0x4f   :  { %v2387_v27 = vld [vmem:[#allocation7 + $0xa8] ss:$16 sps:$4 sm:$0xff]   ;;  %v2390_v28 = vld [vmem:[#allocation7 + $0xcc] ss:$16 sps:$4 sm:$0xff]   ;;  %v2393_v29 = vld [vmem:[#allocation7 + $0xe0] ss:$16 sps:$4 sm:$0xff]  }
  0x50   :  { %v2397_v30 = vld [vmem:[#allocation7 + $0xc8] ss:$16 sps:$4 sm:$0xff]   ;;  %v2400_v31 = vld [vmem:[#allocation7 + $0xec] ss:$16 sps:$4 sm:$0xff]   ;;  %s1732_s11 = sld [smem:[#allocation2 + $0x8]]  ;;  %s1731_s12 = sshll.u32 %s76_s3, 2 }
  0x51   :  { %328 = vmatpush1.bf16.msra.mxu0 %v2330_v8  ;;  %369 = vmatpush1.bf16.msra.mxu1 %v2351_v15  ;;  %v2404_v32 = vld [vmem:[#allocation7 + $0xe8] ss:$16 sps:$4 sm:$0xff]   ;;  %v86_v34 = vshrl.u32 %v85_v33, 7  ;;  %s78_s14 = scalar_lea.vmem [#allocation6], %s1731_s12  ;;  %vm126_vm0 = vcmask 1040384   ;;  %s1769_s16 = sld [smem:[#allocation2 + $0x1]] }
  0x52   :  { %329 = vmatprep.subr.bf16.mxu0 %v2334_v9  ;;  %370 = vmatprep.subr.bf16.mxu1 %v2354_v16  ;;  %v79_v36 = vld [vmem:[%s78_s14] sm:$0xf]  ;;  %s1771_s17 = sld [smem:[#allocation2 + $0x9]]  ;;  %s1776_s21 = sld [smem:[#allocation2 + $0x2]]  ;;  %vm2238_vm1 = vmmov 0  }
  0x53   :  { %v2446_v35 = vsub.s32 0, %v86_v34  ;;  %v2448_v38 = vsub.s32 1, %v86_v34  ;;  %v2454_v43 = vsub.s32 2, %v86_v34  ;;  %v2460_v51 = vsub.s32 3, %v86_v34  ;;  %s1778_s22 = sld [smem:[#allocation2 + $0xa]]  ;;  %s1783_s27 = sld [smem:[#allocation2 + $0x3]] }
  0x54   :  { %s1785_s28 = sld [smem:[#allocation2 + $0xb]]  ;;  %s1790_s7 = sld [smem:[#allocation2 + $0x4]] }
  0x55   :  { %330 = vmatpush1.bf16.msra.mxu0 %v2343_v12  ;;  %371 = vmatpush1.bf16.msra.mxu1 %v2363_v19  ;;  %v88_v39 = vrot.slane %v79_v36, %v2446_v35  ;;  %v92_v41 = vrot.slane %v79_v36, %v2448_v38  ;;  %v96_v47 = vrot.slane %v79_v36, %v2454_v43  ;;  %s1792_s1 = sld [smem:[#allocation2 + $0xc]]  ;;  %s1799_s12 = sld [smem:[#allocation2 + $0xd]] }
  0x56   :  { %331 = vmatprep.subr.bf16.mxu0 %v2345_v13  ;;  %372 = vmatprep.subr.bf16.mxu1 %v2366_v20  ;;  %s1733_s13 = sshll.u32 %s1732_s11, 2  ;;  %v100_v59 = vrot.slane %v79_v36, %v2460_v51  ;;  %s1797_s11 = sld [smem:[#allocation2 + $0x5]] }
  0x57   :  { %s82_s15 = scalar_lea.vmem [#allocation6], %s1733_s13  ;;  %s1770_s2 = sshll.u32 %s1769_s16, 2 }
  0x58   :  { %v83_v37 = vld [vmem:[%s82_s15] sm:$0xf]  ;;  %s1772_s18 = sshll.u32 %s1771_s17, 2  ;;  %s435_s19 = scalar_lea.vmem [#allocation6], %s1770_s2 }
  0x59   :  { %332 = vmatpush1.bf16.msra.mxu0 %v2357_v17  ;;  %373 = vmatpush1.bf16.msra.mxu1 %v2375_v23  ;;  %v109_v40 = vrot.slane %v83_v37, %v2446_v35  ;;  %v113_v42 = vrot.slane %v83_v37, %v2448_v38  ;;  %v117_v48 = vrot.slane %v83_v37, %v2454_v43  ;;  %s439_s20 = scalar_lea.vmem [#allocation6], %s1772_s18  ;;  %s1777_s23 = sshll.u32 %s1776_s21, 2 }
  0x5a   :  { %333 = vmatprep.subr.bf16.mxu0 %v2360_v18  ;;  %374 = vmatprep.subr.bf16.mxu1 %v2378_v24  ;;  %v121_v60 = vrot.slane %v83_v37, %v2460_v51  ;;  %s1779_s24 = sshll.u32 %s1778_s22, 2  ;;  %s600_s25 = scalar_lea.vmem [#allocation6], %s1777_s23 }
  0x5b   :  { %v127_v44 = vsel %vm126_vm0, %v88_v39, %v109_v40  ;;  %v128_v45 = vsel %vm126_vm0, %v92_v41, %v113_v42  ;;  %v129_v57 = vsel %vm126_vm0, %v96_v47, %v117_v48  ;;  %s604_s26 = scalar_lea.vmem [#allocation6], %s1779_s24  ;;  %s1784_s29 = sshll.u32 %s1783_s27, 2 }
  0x5c   :  { %v130_v34 = vsel %vm126_vm0, %v100_v59, %v121_v60  ;;  %s1786_s30 = sshll.u32 %s1785_s28, 2  ;;  %s765_s0 = scalar_lea.vmem [#allocation6], %s1784_s29 }
  0x5d   :  { %334 = vmatpush1.bf16.msra.mxu0 %v2369_v21  ;;  %375 = vmatpush1.bf16.msra.mxu1 %v2387_v27  ;;  %s769_s6 = scalar_lea.vmem [#allocation6], %s1786_s30  ;;  %s1791_s8 = sshll.u32 %s1790_s7, 2 }
  0x5e   :  { %335 = vmatprep.subr.bf16.mxu0 %v2371_v22  ;;  %376 = vmatprep.subr.bf16.mxu1 %v2390_v28  ;;  %s1793_s9 = sshll.u32 %s1792_s1, 2  ;;  %s930_s10 = scalar_lea.vmem [#allocation6], %s1791_s8 }
  0x5f   :  { %s934_s3 = scalar_lea.vmem [#allocation6], %s1793_s9  ;;  %s1798_s13 = sshll.u32 %s1797_s11, 2 }
  0x60   :  { %s1800_s14 = sshll.u32 %s1799_s12, 2  ;;  %s1095_s15 = scalar_lea.vmem [#allocation6], %s1798_s13 }
  0x61   :  { %336 = vmatpush1.bf16.msra.mxu0 %v2381_v25  ;;  %377 = vmatpush1.bf16.msra.mxu1 %v2397_v30  ;;  %s1099_s16 = scalar_lea.vmem [#allocation6], %s1800_s14  ;;  %s1804_s17 = sld [smem:[#allocation2 + $0x6]] }
  0x62   :  { %337 = vmatprep.subr.bf16.mxu0 %v2384_v26  ;;  %378 = vmatprep.subr.bf16.mxu1 %v2400_v31  ;;  %s1806_s2 = sld [smem:[#allocation2 + $0xe]]  ;;  %s1811_s22 = sld [smem:[#allocation2 + $0x7]] }
  0x63   :  { %s1813_s23 = sld [smem:[#allocation2 + $0xf]]  ;;  %s2240_s30 = smov [#allocation10]  }
  0x65   :  { %338 = vmatpush1.bf16.msra.mxu0 %v2393_v29  ;;  %379 = vmatpush1.bf16.msra.mxu1 %v2404_v32 }
  0x66   :  { %488 = vmatprep.subr.bf16.mxu0 %v2310_v0  ;;  %529 = vmatprep.subr.bf16.mxu1 %v2325_v6 }
  0x67   :  { %s1805_s18 = sshll.u32 %s1804_s17, 2 }
  0x68   :  { %356 = vmatmul.mubr.bf16.vlgmr.msra.gmra.mrb[0].mxu0 %v2236_v2  ;;  %397 = vmatmul.mubr.bf16.vlgmr.msra.gmra.mrb[0].mxu1 %v2236_v2  ;;  %s1812_s24 = sshll.u32 %s1811_s22, 2 }
  0x69   :  { %489 = vmatpush1.bf16.msra.mxu0 %v2312_v1  ;;  %520 = vmatprep.mubr.bf16.mxu0 %v2236_v2 }
  0x6a   :  { %490 = vmatprep.subr.bf16.mxu0 %v2317_v3  ;;  %530 = vmatpush1.bf16.msra.mxu1 %v2327_v7 }
  0x6b   :  { %531 = vmatprep.subr.bf16.mxu1 %v2337_v10  ;;  %561 = vmatprep.mubr.bf16.mxu1 %v2236_v2 }
  0x6d   :  { %491 = vmatpush1.bf16.msra.mxu0 %v2320_v4 }
  0x6e   :  { %492 = vmatprep.subr.bf16.mxu0 %v2323_v5  ;;  %532 = vmatpush1.bf16.msra.mxu1 %v2339_v11 }
  0x6f   :  { %533 = vmatprep.subr.bf16.mxu1 %v2347_v14 }
  0x71   :  { %493 = vmatpush1.bf16.msra.mxu0 %v2330_v8 }
  0x72   :  { %494 = vmatprep.subr.bf16.mxu0 %v2334_v9  ;;  %534 = vmatpush1.bf16.msra.mxu1 %v2351_v15 }
  0x73   :  { %535 = vmatprep.subr.bf16.mxu1 %v2354_v16 }
  0x75   :  { %495 = vmatpush1.bf16.msra.mxu0 %v2343_v12 }
  0x76   :  { %496 = vmatprep.subr.bf16.mxu0 %v2345_v13  ;;  %536 = vmatpush1.bf16.msra.mxu1 %v2363_v19 }
  0x77   :  { %537 = vmatprep.subr.bf16.mxu1 %v2366_v20 }
  0x79   :  { %497 = vmatpush1.bf16.msra.mxu0 %v2357_v17 }
  0x7a   :  { %498 = vmatprep.subr.bf16.mxu0 %v2360_v18  ;;  %538 = vmatpush1.bf16.msra.mxu1 %v2375_v23 }
  0x7b   :  { %539 = vmatprep.subr.bf16.mxu1 %v2378_v24 }
  0x7d   :  { %499 = vmatpush1.bf16.msra.mxu0 %v2369_v21 }
  0x7e   :  { %500 = vmatprep.subr.bf16.mxu0 %v2371_v22  ;;  %540 = vmatpush1.bf16.msra.mxu1 %v2387_v27 }
  0x7f   :  { %541 = vmatprep.subr.bf16.mxu1 %v2390_v28 }
  0x81   :  { %501 = vmatpush1.bf16.msra.mxu0 %v2381_v25 }
  0x82   :  { %502 = vmatprep.subr.bf16.mxu0 %v2384_v26  ;;  %542 = vmatpush1.bf16.msra.mxu1 %v2397_v30 }
  0x83   :  { %543 = vmatprep.subr.bf16.mxu1 %v2400_v31 }
  0x85   :  { %503 = vmatpush1.bf16.msra.mxu0 %v2393_v29 }
  0x86   :  { %653 = vmatprep.subr.bf16.mxu0 %v2310_v0  ;;  %544 = vmatpush1.bf16.msra.mxu1 %v2404_v32 }
  0x87   :  { %694 = vmatprep.subr.bf16.mxu1 %v2325_v6 }
 0x13b   :  { %v357_v46 = vpop.f32.mrb[0].mxu0  ;;  %v398_v58 = vpop.f32.mrb[0].mxu1 }
 0x13c   :  { %v405_v49 = vadd.f32 %v357_v46, %v127_v44  ;;  %v359_v50 = vpop.f32.mrb[1].mxu0  ;;  %v400_v61 = vpop.f32.mrb[1].mxu1  ;;  %v407_v62 = vadd.f32 %v398_v58, %v129_v57  ;;  %v436_v57 = vld [vmem:[%s435_s19] sm:$0xf]  ;;  %s1807_s19 = sshll.u32 %s1806_s2, 2 }
 0x13d   :  { %v406_v52 = vadd.f32 %v359_v50, %v128_v45  ;;  %v361_v53 = vpop.f32.mrb[2].mxu0  ;;  %v402_v63 = vpop.f32.mrb[2].mxu1  ;;  %v408_v40 = vadd.f32 %v400_v61, %v130_v34  ;;  %v440_v58 = vld [vmem:[%s439_s20] sm:$0xf]  ;;  %v445_v59 = vrot.slane %v436_v57, %v2446_v35  ;;  %v449_v61 = vrot.slane %v436_v57, %v2448_v38  ;;  %s1260_s20 = scalar_lea.vmem [#allocation6], %s1805_s18  ;;  %s1264_s21 = scalar_lea.vmem [#allocation6], %s1807_s19 }
 0x13e   :  { %v1766_v54 = vmul.f32 -1.442695, %v405_v49  ;;  %v362_v55 = vpop.f32.mrb[3].mxu0  ;;  %v403_v33 = vpop.f32.mrb[3].mxu1  ;;  %v1768_v39 = vmul.f32 -1.442695, %v407_v62  ;;  %v466_v60 = vrot.slane %v440_v58, %v2446_v35  ;;  %v470_v62 = vrot.slane %v440_v58, %v2448_v38 }
 0x13f   :  { %v1767_v56 = vmul.f32 -1.442695, %v406_v52 }
 0x140   :  { %1958 = vpow2.f32 %v1766_v54  ;;  %v483_v63 = vsel %vm126_vm0, %v445_v59, %v466_v60  ;;  %v484_v33 = vsel %vm126_vm0, %v449_v61, %v470_v62 }
 0x141   :  { %1960 = vpow2.f32 %v1767_v56 }
 0x142   :  { %1962 = vpow2.f32 %v1768_v39 }
 0x143   :  { %1964 = vtanh.f32 %v408_v40 }
 0x14a   :  { %v1959_v41 = vpop.eup %1958 }
 0x14b   :  { %v1961_v42 = vpop.eup %1960  ;;  %v418_v44 = vadd.f32 1.0, %v1959_v41 }
 0x14c   :  { %v419_v45 = vadd.f32 1.0, %v1961_v42  ;;  %v1963_v36 = vpop.eup %1962 }
 0x14d   :  { %1966 = vrcp.f32 %v418_v44  ;;  %v1965_v46 = vpop.eup %1964  ;;  %v420_v47 = vadd.f32 1.0, %v1963_v36  ;;  %v453_v44 = vrot.slane %v436_v57, %v2454_v43 }
 0x14e   :  { %1968 = vrcp.f32 %v419_v45  ;;  %v474_v45 = vrot.slane %v440_v58, %v2454_v43 }
 0x14f   :  { %1970 = vrcp.f32 %v420_v47 }
 0x157   :  { %v1967_v37 = vpop.eup %1966 }
 0x158   :  { %v1969_v48 = vpop.eup %1968  ;;  %v429_v49 = vmul.f32 %v1967_v37, %v1965_v46 }
 0x159   :  { %v428_v50 = vmul.f32 0.0, %v1969_v48  ;;  %v1971_v53 = vpop.eup %1970 }
 0x15b   :  { %v2466_v52 = vadd.f32 %v429_v49, %v428_v50 }
 0x15d   :  { %1972 = vtanh.f32 %v2466_v52 }
 0x167   :  { %v1973_v54 = vpop.eup %1972 }
 0x168   :  { %v432_v55 = vmul.f32 %v1973_v54, %v1971_v53  ;;  %v457_v53 = vrot.slane %v436_v57, %v2460_v51  ;;  %v478_v54 = vrot.slane %v440_v58, %v2460_v51 }
 0x16a   :  { %v487_v56 = vpack.c.bf16 %v432_v55, %v432_v55  ;;  %v485_v55 = vsel %vm126_vm0, %v453_v44, %v474_v45  ;;  %v486_v59 = vsel %vm126_vm0, %v457_v53, %v478_v54 }
 0x16c   :  { %521 = vmatmul.mubr.bf16.vlgmr.msra.gmra.mrb[4].mxu0 %v487_v56  ;;  %562 = vmatmul.mubr.bf16.vlgmr.msra.gmra.mrb[4].mxu1 %v487_v56 }
 0x16d   :  { %654 = vmatpush1.bf16.msra.mxu0 %v2312_v1  ;;  %695 = vmatpush1.bf16.msra.mxu1 %v2327_v7 }
 0x16e   :  { %655 = vmatprep.subr.bf16.mxu0 %v2317_v3  ;;  %696 = vmatprep.subr.bf16.mxu1 %v2337_v10 }
 0x16f   :  { %685 = vmatprep.mubr.bf16.mxu0 %v2236_v2  ;;  %726 = vmatprep.mubr.bf16.mxu1 %v2236_v2 }
 0x171   :  { %656 = vmatpush1.bf16.msra.mxu0 %v2320_v4  ;;  %697 = vmatpush1.bf16.msra.mxu1 %v2339_v11 }
 0x172   :  { %657 = vmatprep.subr.bf16.mxu0 %v2323_v5  ;;  %698 = vmatprep.subr.bf16.mxu1 %v2347_v14 }
 0x175   :  { %658 = vmatpush1.bf16.msra.mxu0 %v2330_v8  ;;  %699 = vmatpush1.bf16.msra.mxu1 %v2351_v15 }
 0x176   :  { %659 = vmatprep.subr.bf16.mxu0 %v2334_v9  ;;  %700 = vmatprep.subr.bf16.mxu1 %v2354_v16 }
 0x179   :  { %660 = vmatpush1.bf16.msra.mxu0 %v2343_v12  ;;  %701 = vmatpush1.bf16.msra.mxu1 %v2363_v19 }
 0x17a   :  { %661 = vmatprep.subr.bf16.mxu0 %v2345_v13  ;;  %702 = vmatprep.subr.bf16.mxu1 %v2366_v20 }
 0x17d   :  { %662 = vmatpush1.bf16.msra.mxu0 %v2357_v17  ;;  %703 = vmatpush1.bf16.msra.mxu1 %v2375_v23 }
 0x17e   :  { %663 = vmatprep.subr.bf16.mxu0 %v2360_v18  ;;  %704 = vmatprep.subr.bf16.mxu1 %v2378_v24 }
 0x181   :  { %664 = vmatpush1.bf16.msra.mxu0 %v2369_v21  ;;  %705 = vmatpush1.bf16.msra.mxu1 %v2387_v27 }
 0x182   :  { %665 = vmatprep.subr.bf16.mxu0 %v2371_v22  ;;  %706 = vmatprep.subr.bf16.mxu1 %v2390_v28 }
 0x185   :  { %666 = vmatpush1.bf16.msra.mxu0 %v2381_v25  ;;  %707 = vmatpush1.bf16.msra.mxu1 %v2397_v30 }
 0x186   :  { %667 = vmatprep.subr.bf16.mxu0 %v2384_v26  ;;  %708 = vmatprep.subr.bf16.mxu1 %v2400_v31 }
 0x189   :  { %668 = vmatpush1.bf16.msra.mxu0 %v2393_v29  ;;  %709 = vmatpush1.bf16.msra.mxu1 %v2404_v32 }
 0x18a   :  { %818 = vmatprep.subr.bf16.mxu0 %v2310_v0  ;;  %859 = vmatprep.subr.bf16.mxu1 %v2325_v6 }
 0x23f   :  { %v522_v34 = vpop.f32.mrb[4].mxu0  ;;  %v563_v39 = vpop.f32.mrb[4].mxu1 }
 0x240   :  { %v570_v40 = vadd.f32 %v522_v34, %v483_v63  ;;  %v524_v41 = vpop.f32.mrb[5].mxu0  ;;  %v565_v42 = vpop.f32.mrb[5].mxu1  ;;  %v572_v56 = vadd.f32 %v563_v39, %v485_v55 }
 0x241   :  { %v571_v36 = vadd.f32 %v524_v41, %v484_v33  ;;  %v526_v46 = vpop.f32.mrb[6].mxu0  ;;  %v567_v37 = vpop.f32.mrb[6].mxu1  ;;  %v573_v60 = vadd.f32 %v565_v42, %v486_v59 }
 0x242   :  { %v1773_v47 = vmul.f32 -1.442695, %v570_v40  ;;  %v527_v48 = vpop.f32.mrb[7].mxu0  ;;  %v568_v49 = vpop.f32.mrb[7].mxu1  ;;  %v1775_v61 = vmul.f32 -1.442695, %v572_v56 }
 0x243   :  { %v1774_v50 = vmul.f32 -1.442695, %v571_v36  ;;  %v605_v48 = vld [vmem:[%s604_s26] sm:$0xf]  ;;  %s1425_s26 = scalar_lea.vmem [#allocation6], %s1812_s24 }
 0x244   :  { %1974 = vpow2.f32 %v1773_v47  ;;  %v635_v54 = vrot.slane %v605_v48, %v2448_v38 }
 0x245   :  { %1976 = vpow2.f32 %v1774_v50  ;;  %v631_v50 = vrot.slane %v605_v48, %v2446_v35 }
 0x246   :  { %1978 = vtanh.f32 %v573_v60 }
 0x247   :  { %1980 = vpow2.f32 %v1775_v61 }
 0x24e   :  { %v1975_v62 = vpop.eup %1974 }
 0x24f   :  { %v583_v63 = vadd.f32 1.0, %v1975_v62  ;;  %v1977_v33 = vpop.eup %1976 }
 0x250   :  { %v584_v34 = vadd.f32 1.0, %v1977_v33  ;;  %v1979_v40 = vpop.eup %1978 }
 0x251   :  { %1982 = vrcp.f32 %v583_v63  ;;  %v1981_v57 = vpop.eup %1980 }
 0x252   :  { %1984 = vrcp.f32 %v584_v34  ;;  %v585_v44 = vadd.f32 1.0, %v1981_v57  ;;  %v639_v34 = vrot.slane %v605_v48, %v2454_v43 }
 0x254   :  { %1986 = vrcp.f32 %v585_v44 }
 0x25b   :  { %v1983_v41 = vpop.eup %1982 }
 0x25c   :  { %v594_v58 = vmul.f32 %v1983_v41, %v1979_v40  ;;  %v1985_v36 = vpop.eup %1984 }
 0x25d   :  { %v593_v39 = vmul.f32 %v1985_v36, %v2466_v52  ;;  %v601_v52 = vld [vmem:[%s600_s25] sm:$0xf]  ;;  %s1814_s25 = sshll.u32 %s1813_s23, 2 }
 0x25e   :  { %v1987_v42 = vpop.eup %1986  ;;  %v610_v49 = vrot.slane %v601_v52, %v2446_v35  ;;  %v614_v53 = vrot.slane %v601_v52, %v2448_v38  ;;  %v618_v33 = vrot.slane %v601_v52, %v2454_v43  ;;  %s1429_s27 = scalar_lea.vmem [#allocation6], %s1814_s25 }
 0x25f   :  { %v2516_v45 = vadd.f32 %v594_v58, %v593_v39 }
 0x260   :  { %v648_v55 = vsel %vm126_vm0, %v610_v49, %v631_v50  ;;  %v649_v56 = vsel %vm126_vm0, %v614_v53, %v635_v54 }
 0x261   :  { %1988 = vtanh.f32 %v2516_v45 }
 0x26b   :  { %v1989_v46 = vpop.eup %1988 }
 0x26c   :  { %v597_v37 = vmul.f32 %v1989_v46, %v1987_v42  ;;  %v622_v42 = vrot.slane %v601_v52, %v2460_v51  ;;  %v643_v46 = vrot.slane %v605_v48, %v2460_v51 }
 0x26e   :  { %v652_v47 = vpack.c.bf16 %v597_v37, %v597_v37  ;;  %v650_v37 = vsel %vm126_vm0, %v618_v33, %v639_v34  ;;  %v651_v49 = vsel %vm126_vm0, %v622_v42, %v643_v46 }
 0x270   :  { %686 = vmatmul.mubr.bf16.vlgmr.msra.gmra.mrb[8].mxu0 %v652_v47  ;;  %727 = vmatmul.mubr.bf16.vlgmr.msra.gmra.mrb[8].mxu1 %v652_v47 }
 0x271   :  { %819 = vmatpush1.bf16.msra.mxu0 %v2312_v1  ;;  %860 = vmatpush1.bf16.msra.mxu1 %v2327_v7 }
 0x272   :  { %820 = vmatprep.subr.bf16.mxu0 %v2317_v3  ;;  %861 = vmatprep.subr.bf16.mxu1 %v2337_v10 }
 0x273   :  { %850 = vmatprep.mubr.bf16.mxu0 %v2236_v2  ;;  %891 = vmatprep.mubr.bf16.mxu1 %v2236_v2 }
 0x275   :  { %821 = vmatpush1.bf16.msra.mxu0 %v2320_v4  ;;  %862 = vmatpush1.bf16.msra.mxu1 %v2339_v11 }
 0x276   :  { %822 = vmatprep.subr.bf16.mxu0 %v2323_v5  ;;  %863 = vmatprep.subr.bf16.mxu1 %v2347_v14 }
 0x279   :  { %823 = vmatpush1.bf16.msra.mxu0 %v2330_v8  ;;  %864 = vmatpush1.bf16.msra.mxu1 %v2351_v15 }
 0x27a   :  { %824 = vmatprep.subr.bf16.mxu0 %v2334_v9  ;;  %865 = vmatprep.subr.bf16.mxu1 %v2354_v16 }
 0x27d   :  { %825 = vmatpush1.bf16.msra.mxu0 %v2343_v12  ;;  %866 = vmatpush1.bf16.msra.mxu1 %v2363_v19 }
 0x27e   :  { %826 = vmatprep.subr.bf16.mxu0 %v2345_v13  ;;  %867 = vmatprep.subr.bf16.mxu1 %v2366_v20 }
 0x281   :  { %827 = vmatpush1.bf16.msra.mxu0 %v2357_v17  ;;  %868 = vmatpush1.bf16.msra.mxu1 %v2375_v23 }
 0x282   :  { %828 = vmatprep.subr.bf16.mxu0 %v2360_v18  ;;  %869 = vmatprep.subr.bf16.mxu1 %v2378_v24 }
 0x285   :  { %829 = vmatpush1.bf16.msra.mxu0 %v2369_v21  ;;  %870 = vmatpush1.bf16.msra.mxu1 %v2387_v27 }
 0x286   :  { %830 = vmatprep.subr.bf16.mxu0 %v2371_v22  ;;  %871 = vmatprep.subr.bf16.mxu1 %v2390_v28 }
 0x289   :  { %831 = vmatpush1.bf16.msra.mxu0 %v2381_v25  ;;  %872 = vmatpush1.bf16.msra.mxu1 %v2397_v30 }
 0x28a   :  { %832 = vmatprep.subr.bf16.mxu0 %v2384_v26  ;;  %873 = vmatprep.subr.bf16.mxu1 %v2400_v31 }
 0x28d   :  { %833 = vmatpush1.bf16.msra.mxu0 %v2393_v29  ;;  %874 = vmatpush1.bf16.msra.mxu1 %v2404_v32 }
 0x28e   :  { %983 = vmatprep.subr.bf16.mxu0 %v2310_v0  ;;  %1024 = vmatprep.subr.bf16.mxu1 %v2325_v6 }
 0x343   :  { %v687_v59 = vpop.f32.mrb[8].mxu0  ;;  %v728_v60 = vpop.f32.mrb[8].mxu1 }
 0x344   :  { %v735_v61 = vadd.f32 %v687_v59, %v648_v55  ;;  %v689_v62 = vpop.f32.mrb[9].mxu0  ;;  %v730_v63 = vpop.f32.mrb[9].mxu1  ;;  %v737_v47 = vadd.f32 %v728_v60, %v650_v37 }
 0x345   :  { %v736_v40 = vadd.f32 %v689_v62, %v649_v56  ;;  %v691_v57 = vpop.f32.mrb[10].mxu0  ;;  %v732_v41 = vpop.f32.mrb[10].mxu1  ;;  %v738_v50 = vadd.f32 %v730_v63, %v651_v49 }
 0x346   :  { %v1780_v58 = vmul.f32 -1.442695, %v735_v61  ;;  %v692_v36 = vpop.f32.mrb[11].mxu0  ;;  %v733_v44 = vpop.f32.mrb[11].mxu1  ;;  %v1782_v53 = vmul.f32 -1.442695, %v737_v47 }
 0x347   :  { %v1781_v39 = vmul.f32 -1.442695, %v736_v40  ;;  %v770_v36 = vld [vmem:[%s769_s6] sm:$0xf] }
 0x348   :  { %1990 = vpow2.f32 %v1780_v58  ;;  %v800_v46 = vrot.slane %v770_v36, %v2448_v38 }
 0x349   :  { %1992 = vpow2.f32 %v1781_v39  ;;  %v796_v39 = vrot.slane %v770_v36, %v2446_v35 }
 0x34a   :  { %1994 = vtanh.f32 %v738_v50 }
 0x34b   :  { %1996 = vpow2.f32 %v1782_v53 }
 0x352   :  { %v1991_v54 = vpop.eup %1990 }
 0x353   :  { %v748_v55 = vadd.f32 1.0, %v1991_v54  ;;  %v1993_v56 = vpop.eup %1992 }
 0x354   :  { %v749_v59 = vadd.f32 1.0, %v1993_v56  ;;  %v1995_v61 = vpop.eup %1994  ;;  %v804_v56 = vrot.slane %v770_v36, %v2454_v43 }
 0x355   :  { %1998 = vrcp.f32 %v748_v55  ;;  %v1997_v52 = vpop.eup %1996 }
 0x356   :  { %2000 = vrcp.f32 %v749_v59  ;;  %v750_v33 = vadd.f32 1.0, %v1997_v52 }
 0x358   :  { %2002 = vrcp.f32 %v750_v33 }
 0x35f   :  { %v1999_v62 = vpop.eup %1998 }
 0x360   :  { %v759_v48 = vmul.f32 %v1999_v62, %v1995_v61  ;;  %v2001_v40 = vpop.eup %2000 }
 0x361   :  { %v758_v60 = vmul.f32 %v2001_v40, %v2516_v45  ;;  %v766_v45 = vld [vmem:[%s765_s0] sm:$0xf]  ;;  %s1688_s0 = sshll.u32 %s2240_s30, 4  ;;  %s1689_s0 = int_to_ptr.vmem [resolvable:$true] %s1688_s0 }
 0x362   :  { %v2003_v63 = vpop.eup %2002  ;;  %v775_v44 = vrot.slane %v766_v45, %v2446_v35  ;;  %v779_v42 = vrot.slane %v766_v45, %v2448_v38  ;;  %v783_v55 = vrot.slane %v766_v45, %v2454_v43  ;;  %s2196_s6 = scalar_lea.vmem %s1689_s0, 32  ;;  %p2201_p2 = scmp.lt.s32.totalorder %s1689_s0, %s1689_s0 }
 0x363   :  { %v2566_v34 = vadd.f32 %v759_v48, %v758_v60  ;;  %v787_v60 = vrot.slane %v766_v45, %v2460_v51  ;;  %p2197_p1 = scmp.ne.s32.totalorder %s1689_s0, %s2196_s6  ;;  %p2202_p3 = scmp.lt.s32.totalorder %s2196_s6, %s2196_s6 }
 0x364   :  { %v814_v37 = vsel %vm126_vm0, %v779_v42, %v800_v46 }
 0x365   :  { %2004 = vtanh.f32 %v2566_v34  ;;  %p2203_p4 = por %p2202_p3, %p2201_p2 }
 0x367   :  { %p2204_p5 = pnand %p2203_p4, %p2197_p1 }
 0x36f   :  { %v2005_v57 = vpop.eup %2004 }
 0x370   :  { %v762_v41 = vmul.f32 %v2005_v57, %v2003_v63  ;;  %v808_v63 = vrot.slane %v770_v36, %v2460_v51  ;;  %v815_v57 = vsel %vm126_vm0, %v783_v55, %v804_v56 }
 0x372   :  { %v817_v58 = vpack.c.bf16 %v762_v41, %v762_v41 }
 0x374   :  { %851 = vmatmul.mubr.bf16.vlgmr.msra.gmra.mrb[12].mxu0 %v817_v58  ;;  %892 = vmatmul.mubr.bf16.vlgmr.msra.gmra.mrb[12].mxu1 %v817_v58  ;;  %v816_v58 = vsel %vm126_vm0, %v787_v60, %v808_v63 }
 0x375   :  { %984 = vmatpush1.bf16.msra.mxu0 %v2312_v1  ;;  %1025 = vmatpush1.bf16.msra.mxu1 %v2327_v7 }
 0x376   :  { %985 = vmatprep.subr.bf16.mxu0 %v2317_v3  ;;  %1026 = vmatprep.subr.bf16.mxu1 %v2337_v10 }
 0x377   :  { %1015 = vmatprep.mubr.bf16.mxu0 %v2236_v2  ;;  %1056 = vmatprep.mubr.bf16.mxu1 %v2236_v2 }
 0x379   :  { %986 = vmatpush1.bf16.msra.mxu0 %v2320_v4  ;;  %1027 = vmatpush1.bf16.msra.mxu1 %v2339_v11 }
 0x37a   :  { %987 = vmatprep.subr.bf16.mxu0 %v2323_v5  ;;  %1028 = vmatprep.subr.bf16.mxu1 %v2347_v14 }
 0x37d   :  { %988 = vmatpush1.bf16.msra.mxu0 %v2330_v8  ;;  %1029 = vmatpush1.bf16.msra.mxu1 %v2351_v15 }
 0x37e   :  { %989 = vmatprep.subr.bf16.mxu0 %v2334_v9  ;;  %1030 = vmatprep.subr.bf16.mxu1 %v2354_v16 }
 0x381   :  { %990 = vmatpush1.bf16.msra.mxu0 %v2343_v12  ;;  %1031 = vmatpush1.bf16.msra.mxu1 %v2363_v19 }
 0x382   :  { %991 = vmatprep.subr.bf16.mxu0 %v2345_v13  ;;  %1032 = vmatprep.subr.bf16.mxu1 %v2366_v20 }
 0x385   :  { %992 = vmatpush1.bf16.msra.mxu0 %v2357_v17  ;;  %1033 = vmatpush1.bf16.msra.mxu1 %v2375_v23 }
 0x386   :  { %993 = vmatprep.subr.bf16.mxu0 %v2360_v18  ;;  %1034 = vmatprep.subr.bf16.mxu1 %v2378_v24 }
 0x389   :  { %994 = vmatpush1.bf16.msra.mxu0 %v2369_v21  ;;  %1035 = vmatpush1.bf16.msra.mxu1 %v2387_v27 }
 0x38a   :  { %995 = vmatprep.subr.bf16.mxu0 %v2371_v22  ;;  %1036 = vmatprep.subr.bf16.mxu1 %v2390_v28 }
 0x38d   :  { %996 = vmatpush1.bf16.msra.mxu0 %v2381_v25  ;;  %1037 = vmatpush1.bf16.msra.mxu1 %v2397_v30 }
 0x38e   :  { %997 = vmatprep.subr.bf16.mxu0 %v2384_v26  ;;  %1038 = vmatprep.subr.bf16.mxu1 %v2400_v31 }
 0x391   :  { %998 = vmatpush1.bf16.msra.mxu0 %v2393_v29  ;;  %1039 = vmatpush1.bf16.msra.mxu1 %v2404_v32 }
 0x392   :  { %1148 = vmatprep.subr.bf16.mxu0 %v2310_v0  ;;  %1189 = vmatprep.subr.bf16.mxu1 %v2325_v6  ;;  %v813_v0 = vsel %vm126_vm0, %v775_v44, %v796_v39 }
 0x447   :  { %v852_v47 = vpop.f32.mrb[12].mxu0  ;;  %v893_v49 = vpop.f32.mrb[12].mxu1 }
 0x448   :  { %v900_v50 = vadd.f32 %v852_v47, %v813_v0  ;;  %v854_v53 = vpop.f32.mrb[13].mxu0  ;;  %v895_v54 = vpop.f32.mrb[13].mxu1  ;;  %v902_v41 = vadd.f32 %v893_v49, %v815_v57 }
 0x449   :  { %v901_v59 = vadd.f32 %v854_v53, %v814_v37  ;;  %v856_v61 = vpop.f32.mrb[14].mxu0  ;;  %v897_v52 = vpop.f32.mrb[14].mxu1  ;;  %v903_v44 = vadd.f32 %v895_v54, %v816_v58 }
 0x44a   :  { %v1787_v62 = vmul.f32 -1.442695, %v900_v50  ;;  %v857_v48 = vpop.f32.mrb[15].mxu0  ;;  %v898_v40 = vpop.f32.mrb[15].mxu1  ;;  %v1789_v39 = vmul.f32 -1.442695, %v902_v41 }
 0x44b   :  { %v1788_v33 = vmul.f32 -1.442695, %v901_v59 }
 0x44c   :  { %2006 = vpow2.f32 %v1787_v62 }
 0x44d   :  { %2008 = vpow2.f32 %v1788_v33 }
 0x44e   :  { %2010 = vtanh.f32 %v903_v44 }
 0x44f   :  { %2012 = vpow2.f32 %v1789_v39 }
 0x456   :  { %v2007_v42 = vpop.eup %2006 }
 0x457   :  { %v913_v46 = vadd.f32 1.0, %v2007_v42  ;;  %v2009_v0 = vpop.eup %2008 }
 0x458   :  { %v914_v37 = vadd.f32 1.0, %v2009_v0  ;;  %v2011_v47 = vpop.eup %2010 }
 0x459   :  { %2014 = vrcp.f32 %v913_v46  ;;  %v2013_v45 = vpop.eup %2012 }
 0x45a   :  { %2016 = vrcp.f32 %v914_v37  ;;  %v915_v55 = vadd.f32 1.0, %v2013_v45  ;;  %v2671_v37 = vld [vmem:[#allocation7] ss:$16 sps:$4 sm:$0xff]   ;;  %v2677_v45 = vld [vmem:[#allocation7 + $0x24] ss:$16 sps:$4 sm:$0xff]  }
 0x45c   :  { %2018 = vrcp.f32 %v915_v55  ;;  %v2691_v55 = vld [vmem:[#allocation7 + $0x44] ss:$16 sps:$4 sm:$0xff]  }
 0x463   :  { %v2015_v50 = vpop.eup %2014 }
 0x464   :  { %v924_v36 = vmul.f32 %v2015_v50, %v2011_v47  ;;  %v2017_v53 = vpop.eup %2016  ;;  %v2674_v47 = vld [vmem:[#allocation7 + $0x8] ss:$16 sps:$4 sm:$0xff]   ;;  %v2680_v50 = vld [vmem:[#allocation7 + $0x2c] ss:$16 sps:$4 sm:$0xff]  }
 0x465   :  { %v923_v49 = vmul.f32 %v2017_v53, %v2566_v34  ;;  %v2688_v53 = vld [vmem:[#allocation7 + $0x28] ss:$16 sps:$4 sm:$0xff]  }
 0x466   :  { %v2019_v54 = vpop.eup %2018 }
 0x467   :  { %v2616_v56 = vadd.f32 %v924_v36, %v923_v49  ;;  %v2685_v36 = vld [vmem:[#allocation7 + $0x20] ss:$16 sps:$4 sm:$0xff]   ;;  %v2694_v49 = vld [vmem:[#allocation7 + $0x4c] ss:$16 sps:$4 sm:$0xff]  }
 0x469   :  { %2020 = vtanh.f32 %v2616_v56 }
 0x473   :  { %v2021_v59 = vpop.eup %2020 }
 0x474   :  { %v927_v61 = vmul.f32 %v2021_v59, %v2019_v54  ;;  %v2700_v54 = vld [vmem:[#allocation7 + $0x48] ss:$16 sps:$4 sm:$0xff]   ;;  %v2703_v59 = vld [vmem:[#allocation7 + $0x64] ss:$16 sps:$4 sm:$0xff]  }
 0x476   :  { %v982_v52 = vpack.c.bf16 %v927_v61, %v927_v61  ;;  %v2706_v61 = vld [vmem:[#allocation7 + $0x6c] ss:$16 sps:$4 sm:$0xff]  }
 0x478   :  { %1016 = vmatmul.mubr.bf16.vlgmr.msra.gmra.mrb[16].mxu0 %v982_v52  ;;  %1057 = vmatmul.mubr.bf16.vlgmr.msra.gmra.mrb[16].mxu1 %v982_v52  ;;  %v2709_v52 = vld [vmem:[#allocation7 + $0x60] ss:$16 sps:$4 sm:$0xff]  }
 0x479   :  { %1149 = vmatpush1.bf16.msra.mxu0 %v2312_v1  ;;  %1190 = vmatpush1.bf16.msra.mxu1 %v2327_v7  ;;  %v2651_v1 = vld [vmem:[#allocation7 + $0x4] ss:$16 sps:$4 sm:$0xff]  }
 0x47a   :  { %1150 = vmatprep.subr.bf16.mxu0 %v2317_v3  ;;  %1191 = vmatprep.subr.bf16.mxu1 %v2337_v10  ;;  %v931_v3 = vld [vmem:[%s930_s10] sm:$0xf] }
 0x47b   :  { %1180 = vmatprep.mubr.bf16.mxu0 %v2236_v2  ;;  %1221 = vmatprep.mubr.bf16.mxu1 %v2236_v2 }
 0x47d   :  { %1151 = vmatpush1.bf16.msra.mxu0 %v2320_v4  ;;  %1192 = vmatpush1.bf16.msra.mxu1 %v2339_v11  ;;  %v935_v4 = vld [vmem:[%s934_s3] sm:$0xf] }
 0x47e   :  { %1152 = vmatprep.subr.bf16.mxu0 %v2323_v5  ;;  %1193 = vmatprep.subr.bf16.mxu1 %v2347_v14  ;;  %v940_v5 = vrot.slane %v931_v3, %v2446_v35  ;;  %v961_v7 = vrot.slane %v935_v4, %v2446_v35 }
 0x480   :  { %v978_v10 = vsel %vm126_vm0, %v940_v5, %v961_v7  ;;  %v2718_v5 = vld [vmem:[#allocation7 + $0x8c] ss:$16 sps:$4 sm:$0xff]   ;;  %v2721_v7 = vld [vmem:[#allocation7 + $0x80] ss:$16 sps:$4 sm:$0xff]  }
 0x481   :  { %1153 = vmatpush1.bf16.msra.mxu0 %v2330_v8  ;;  %1194 = vmatpush1.bf16.msra.mxu1 %v2351_v15  ;;  %v944_v8 = vrot.slane %v931_v3, %v2448_v38 }
 0x482   :  { %1154 = vmatprep.subr.bf16.mxu0 %v2334_v9  ;;  %1195 = vmatprep.subr.bf16.mxu1 %v2354_v16  ;;  %v965_v9 = vrot.slane %v935_v4, %v2448_v38  ;;  %v948_v16 = vrot.slane %v931_v3, %v2454_v43 }
 0x485   :  { %1155 = vmatpush1.bf16.msra.mxu0 %v2343_v12  ;;  %1196 = vmatpush1.bf16.msra.mxu1 %v2363_v19 }
 0x486   :  { %1156 = vmatprep.subr.bf16.mxu0 %v2345_v13  ;;  %1197 = vmatprep.subr.bf16.mxu1 %v2366_v20 }
 0x489   :  { %1157 = vmatpush1.bf16.msra.mxu0 %v2357_v17  ;;  %1198 = vmatpush1.bf16.msra.mxu1 %v2375_v23  ;;  %v969_v17 = vrot.slane %v935_v4, %v2454_v43 }
 0x48a   :  { %1158 = vmatprep.subr.bf16.mxu0 %v2360_v18  ;;  %1199 = vmatprep.subr.bf16.mxu1 %v2378_v24 }
 0x48d   :  { %1159 = vmatpush1.bf16.msra.mxu0 %v2369_v21  ;;  %1200 = vmatpush1.bf16.msra.mxu1 %v2387_v27  ;;  %v980_v27 = vsel %vm126_vm0, %v948_v16, %v969_v17  ;;  %v2751_v16 = vld [vmem:[#allocation7 + $0xe4] ss:$16 sps:$4 sm:$0xff]   ;;  %v2754_v17 = vld [vmem:[#allocation7 + $0xec] ss:$16 sps:$4 sm:$0xff]  }
 0x48e   :  { %1160 = vmatprep.subr.bf16.mxu0 %v2371_v22  ;;  %1201 = vmatprep.subr.bf16.mxu1 %v2390_v28 }
 0x491   :  { %1161 = vmatpush1.bf16.msra.mxu0 %v2381_v25  ;;  %1202 = vmatpush1.bf16.msra.mxu1 %v2397_v30  ;;  %v952_v25 = vrot.slane %v931_v3, %v2460_v51  ;;  %v2712_v3 = vld [vmem:[#allocation7 + $0x68] ss:$16 sps:$4 sm:$0xff]  }
 0x492   :  { %1162 = vmatprep.subr.bf16.mxu0 %v2384_v26  ;;  %1203 = vmatprep.subr.bf16.mxu1 %v2400_v31  ;;  %v973_v26 = vrot.slane %v935_v4, %v2460_v51  ;;  %v2715_v4 = vld [vmem:[#allocation7 + $0x84] ss:$16 sps:$4 sm:$0xff]  }
 0x495   :  { %1163 = vmatpush1.bf16.msra.mxu0 %v2393_v29  ;;  %1204 = vmatpush1.bf16.msra.mxu1 %v2404_v32  ;;  %v981_v29 = vsel %vm126_vm0, %v952_v25, %v973_v26 }
 0x496   :  { %1313 = vmatprep.subr.bf16.mxu0 %v2651_v1  ;;  %1354 = vmatprep.subr.bf16.mxu1 %v2325_v6  ;;  %v979_v6 = vsel %vm126_vm0, %v944_v8, %v965_v9  ;;  %v2724_v8 = vld [vmem:[#allocation7 + $0x88] ss:$16 sps:$4 sm:$0xff]   ;;  %v2727_v9 = vld [vmem:[#allocation7 + $0xa4] ss:$16 sps:$4 sm:$0xff]  }
 0x54b   :  { %v1017_v11 = vpop.f32.mrb[16].mxu0  ;;  %v1058_v12 = vpop.f32.mrb[16].mxu1 }
 0x54c   :  { %v1065_v13 = vadd.f32 %v1017_v11, %v978_v10  ;;  %v1019_v14 = vpop.f32.mrb[17].mxu0  ;;  %v1060_v15 = vpop.f32.mrb[17].mxu1  ;;  %v1067_v28 = vadd.f32 %v1058_v12, %v980_v27  ;;  %v2730_v10 = vld [vmem:[#allocation7 + $0xac] ss:$16 sps:$4 sm:$0xff]   ;;  %v2736_v11 = vld [vmem:[#allocation7 + $0xa8] ss:$16 sps:$4 sm:$0xff]  }
 0x54d   :  { %v1066_v18 = vadd.f32 %v1019_v14, %v979_v6  ;;  %v1021_v19 = vpop.f32.mrb[18].mxu0  ;;  %v1062_v20 = vpop.f32.mrb[18].mxu1  ;;  %v1068_v30 = vadd.f32 %v1060_v15, %v981_v29  ;;  %v2733_v6 = vld [vmem:[#allocation7 + $0xa0] ss:$16 sps:$4 sm:$0xff]   ;;  %v2739_v12 = vld [vmem:[#allocation7 + $0xc4] ss:$16 sps:$4 sm:$0xff]  }
 0x54e   :  { %v1794_v21 = vmul.f32 -1.442695, %v1065_v13  ;;  %v1022_v22 = vpop.f32.mrb[19].mxu0  ;;  %v1063_v23 = vpop.f32.mrb[19].mxu1  ;;  %v1796_v31 = vmul.f32 -1.442695, %v1067_v28 }
 0x54f   :  { %v1795_v24 = vmul.f32 -1.442695, %v1066_v18  ;;  %v2742_v13 = vld [vmem:[#allocation7 + $0xcc] ss:$16 sps:$4 sm:$0xff]   ;;  %v2745_v14 = vld [vmem:[#allocation7 + $0xc0] ss:$16 sps:$4 sm:$0xff]  }
 0x550   :  { %2022 = vpow2.f32 %v1794_v21  ;;  %v2748_v15 = vld [vmem:[#allocation7 + $0xc8] ss:$16 sps:$4 sm:$0xff]   ;;  %v2757_v18 = vld [vmem:[#allocation7 + $0xe0] ss:$16 sps:$4 sm:$0xff]   ;;  %v2117_v20 = vld [vmem:[#allocation7 + $0xc] ss:$16 sps:$4 sm:$0xff]  }
 0x551   :  { %2024 = vpow2.f32 %v1795_v24  ;;  %v2760_v19 = vld [vmem:[#allocation7 + $0xe8] ss:$16 sps:$4 sm:$0xff]   ;;  %v1096_v21 = vld [vmem:[%s1095_s15] sm:$0xf] }
 0x552   :  { %2026 = vtanh.f32 %v1068_v30  ;;  %v1100_v22 = vld [vmem:[%s1099_s16] sm:$0xf]  ;;  %v1105_v23 = vrot.slane %v1096_v21, %v2446_v35  ;;  %v1109_v25 = vrot.slane %v1096_v21, %v2448_v38 }
 0x553   :  { %2028 = vpow2.f32 %v1796_v31  ;;  %v1126_v24 = vrot.slane %v1100_v22, %v2446_v35  ;;  %v1130_v26 = vrot.slane %v1100_v22, %v2448_v38 }
 0x555   :  { %v1144_v27 = vsel %vm126_vm0, %v1109_v25, %v1130_v26 }
 0x55a   :  { %v2023_v32 = vpop.eup %2022 }
 0x55b   :  { %v1078_v34 = vadd.f32 1.0, %v2023_v32  ;;  %v2025_v62 = vpop.eup %2024 }
 0x55c   :  { %v1079_v48 = vadd.f32 1.0, %v2025_v62  ;;  %v2027_v40 = vpop.eup %2026  ;;  %v1134_v62 = vrot.slane %v1100_v22, %v2454_v43 }
 0x55d   :  { %2030 = vrcp.f32 %v1078_v34  ;;  %v2029_v33 = vpop.eup %2028  ;;  %v1113_v34 = vrot.slane %v1096_v21, %v2454_v43 }
 0x55e   :  { %2032 = vrcp.f32 %v1079_v48  ;;  %v1080_v41 = vadd.f32 1.0, %v2029_v33 }
 0x560   :  { %2034 = vrcp.f32 %v1080_v41 }
 0x567   :  { %v2031_v60 = vpop.eup %2030 }
 0x568   :  { %v1089_v63 = vmul.f32 %v2031_v60, %v2027_v40  ;;  %v2033_v57 = vpop.eup %2032 }
 0x569   :  { %v1088_v58 = vmul.f32 %v2033_v57, %v2616_v56  ;;  %v2697_v56 = vld [vmem:[#allocation7 + $0x40] ss:$16 sps:$4 sm:$0xff]  }
 0x56a   :  { %v2035_v39 = vpop.eup %2034 }
 0x56b   :  { %v2668_v44 = vadd.f32 %v1089_v63, %v1088_v58  ;;  %v1117_v58 = vrot.slane %v1096_v21, %v2460_v51 }
 0x56d   :  { %2036 = vtanh.f32 %v2668_v44 }
 0x577   :  { %v2037_v42 = vpop.eup %2036 }
 0x578   :  { %v1092_v46 = vmul.f32 %v2037_v42, %v2035_v39  ;;  %v1138_v39 = vrot.slane %v1100_v22, %v2460_v51  ;;  %v1145_v42 = vsel %vm126_vm0, %v1113_v34, %v1134_v62 }
 0x57a   :  { %v1147_v0 = vpack.c.bf16 %v1092_v46, %v1092_v46 }
 0x57c   :  { %1181 = vmatmul.mubr.bf16.vlgmr.msra.gmra.mrb[20].mxu0 %v1147_v0  ;;  %1222 = vmatmul.mubr.bf16.vlgmr.msra.gmra.mrb[20].mxu1 %v1147_v0  ;;  %v1146_v0 = vsel %vm126_vm0, %v1117_v58, %v1138_v39 }
 0x57d   :  { %1314 = vmatpush1.bf16.msra.mxu0 %v2671_v37  ;;  %1355 = vmatpush1.bf16.msra.mxu1 %v2674_v47 }
 0x57e   :  { %1315 = vmatprep.subr.bf16.mxu0 %v2677_v45  ;;  %1356 = vmatprep.subr.bf16.mxu1 %v2680_v50 }
 0x57f   :  { %1345 = vmatprep.mubr.bf16.mxu0 %v2236_v2  ;;  %1386 = vmatprep.mubr.bf16.mxu1 %v2236_v2 }
 0x581   :  { %1316 = vmatpush1.bf16.msra.mxu0 %v2685_v36  ;;  %1357 = vmatpush1.bf16.msra.mxu1 %v2688_v53 }
 0x582   :  { %1317 = vmatprep.subr.bf16.mxu0 %v2691_v55  ;;  %1358 = vmatprep.subr.bf16.mxu1 %v2694_v49 }
 0x585   :  { %1318 = vmatpush1.bf16.msra.mxu0 %v2697_v56  ;;  %1359 = vmatpush1.bf16.msra.mxu1 %v2700_v54 }
 0x586   :  { %1319 = vmatprep.subr.bf16.mxu0 %v2703_v59  ;;  %1360 = vmatprep.subr.bf16.mxu1 %v2706_v61 }
 0x589   :  { %1320 = vmatpush1.bf16.msra.mxu0 %v2709_v52  ;;  %1361 = vmatpush1.bf16.msra.mxu1 %v2712_v3 }
 0x58a   :  { %1321 = vmatprep.subr.bf16.mxu0 %v2715_v4  ;;  %1362 = vmatprep.subr.bf16.mxu1 %v2718_v5 }
 0x58d   :  { %1322 = vmatpush1.bf16.msra.mxu0 %v2721_v7  ;;  %1363 = vmatpush1.bf16.msra.mxu1 %v2724_v8 }
 0x58e   :  { %1323 = vmatprep.subr.bf16.mxu0 %v2727_v9  ;;  %1364 = vmatprep.subr.bf16.mxu1 %v2730_v10 }
 0x591   :  { %1324 = vmatpush1.bf16.msra.mxu0 %v2733_v6  ;;  %1365 = vmatpush1.bf16.msra.mxu1 %v2736_v11 }
 0x592   :  { %1325 = vmatprep.subr.bf16.mxu0 %v2739_v12  ;;  %1366 = vmatprep.subr.bf16.mxu1 %v2742_v13 }
 0x595   :  { %1326 = vmatpush1.bf16.msra.mxu0 %v2745_v14  ;;  %1367 = vmatpush1.bf16.msra.mxu1 %v2748_v15 }
 0x596   :  { %1327 = vmatprep.subr.bf16.mxu0 %v2751_v16  ;;  %1368 = vmatprep.subr.bf16.mxu1 %v2754_v17 }
 0x599   :  { %1328 = vmatpush1.bf16.msra.mxu0 %v2757_v18  ;;  %1369 = vmatpush1.bf16.msra.mxu1 %v2760_v19 }
 0x59a   :  { %1478 = vmatprep.subr.bf16.mxu0 %v2651_v1  ;;  %1519 = vmatprep.subr.bf16.mxu1 %v2117_v20  ;;  %v1143_v1 = vsel %vm126_vm0, %v1105_v23, %v1126_v24 }
 0x64f   :  { %v1182_v28 = vpop.f32.mrb[20].mxu0  ;;  %v1223_v29 = vpop.f32.mrb[20].mxu1 }
 0x650   :  { %v1230_v30 = vadd.f32 %v1182_v28, %v1143_v1  ;;  %v1184_v31 = vpop.f32.mrb[21].mxu0  ;;  %v1225_v32 = vpop.f32.mrb[21].mxu1  ;;  %v1232_v46 = vadd.f32 %v1223_v29, %v1145_v42 }
 0x651   :  { %v1231_v48 = vadd.f32 %v1184_v31, %v1144_v27  ;;  %v1186_v40 = vpop.f32.mrb[22].mxu0  ;;  %v1227_v33 = vpop.f32.mrb[22].mxu1  ;;  %v1233_v20 = vadd.f32 %v1225_v32, %v1146_v0 }
 0x652   :  { %v1801_v60 = vmul.f32 -1.442695, %v1230_v30  ;;  %v1187_v63 = vpop.f32.mrb[23].mxu0  ;;  %v1228_v57 = vpop.f32.mrb[23].mxu1  ;;  %v1803_v23 = vmul.f32 -1.442695, %v1232_v46 }
 0x653   :  { %v1802_v41 = vmul.f32 -1.442695, %v1231_v48 }
 0x654   :  { %2038 = vpow2.f32 %v1801_v60 }
 0x655   :  { %2040 = vpow2.f32 %v1802_v41 }
 0x656   :  { %2042 = vtanh.f32 %v1233_v20 }
 0x657   :  { %2044 = vpow2.f32 %v1803_v23 }
 0x65e   :  { %v2039_v24 = vpop.eup %2038 }
 0x65f   :  { %v1243_v25 = vadd.f32 1.0, %v2039_v24  ;;  %v2041_v26 = vpop.eup %2040 }
 0x660   :  { %v1244_v1 = vadd.f32 1.0, %v2041_v26  ;;  %v2043_v27 = vpop.eup %2042  ;;  %v1589_v26 = vld [vmem:[#allocation9 + $0x8] sm:$0xff] }
 0x661   :  { %2046 = vrcp.f32 %v1243_v25  ;;  %v2045_v21 = vpop.eup %2044  ;;  %v1588_v25 = vld [vmem:[#allocation9] sm:$0xff] }
 0x662   :  { %2048 = vrcp.f32 %v1244_v1  ;;  %v1245_v31 = vadd.f32 1.0, %v2045_v21  ;;  %v1872_v1 = vpack.c.bf16 %v1589_v26, %v1588_v25  ;;  %v1590_v21 = vld [vmem:[#allocation9 + $0x10] sm:$0xff] }
 0x664   :  { %2050 = vrcp.f32 %v1245_v31  ;;  %v1593_v31 = vld [vmem:[#allocation9 + $0x28] sm:$0xff] }
 0x66b   :  { %v2047_v28 = vpop.eup %2046 }
 0x66c   :  { %v1254_v22 = vmul.f32 %v2047_v28, %v2043_v27  ;;  %v2049_v30 = vpop.eup %2048  ;;  %v2237_v27 = vmov 0.0|0.0   ;;  %v1591_v28 = vld [vmem:[#allocation9 + $0x18] sm:$0xff] }
 0x66d   :  { %v1253_v29 = vmul.f32 %v2049_v30, %v2668_v44  ;;  %v1265_v44 = vld [vmem:[%s1264_s21] sm:$0xf]  ;;  %v1592_v30 = vld [vmem:[#allocation9 + $0x20] sm:$0xff] }
 0x66e   :  { %v2051_v32 = vpop.eup %2050 }
 0x66f   :  { %v2777_v34 = vadd.f32 %v1254_v22, %v1253_v29  ;;  %v1875_v22 = vpack.c.bf16 %v1591_v28, %v1590_v21  ;;  %v1878_v29 = vpack.c.bf16 %v1593_v31, %v1592_v30  ;;  %v1818_v30 = vld [vmem:[%s2860_s4] ss:$0 sm:$0xff] }
 0x671   :  { %2052 = vtanh.f32 %v2777_v34 }
 0x67b   :  { %v2053_v62 = vpop.eup %2052 }
 0x67c   :  { %v1257_v48 = vmul.f32 %v2053_v62, %v2051_v32  ;;  %v1595_v32 = vld [vmem:[#allocation9 + $0x38] sm:$0xff] }
 0x67e   :  { %v1312_v40 = vpack.c.bf16 %v1257_v48, %v1257_v48  ;;  %v1596_v48 = vld [vmem:[#allocation9 + $0x40] sm:$0xff] }
 0x680   :  { %1346 = vmatmul.mubr.bf16.vlgmr.msra.gmra.mrb[24].mxu0 %v1312_v40  ;;  %1387 = vmatmul.mubr.bf16.vlgmr.msra.gmra.mrb[24].mxu1 %v1312_v40  ;;  %v1597_v40 = vld [vmem:[#allocation9 + $0x48] sm:$0xff] }
 0x681   :  { %1479 = vmatpush1.bf16.msra.mxu0 %v2671_v37  ;;  %1520 = vmatpush1.bf16.msra.mxu1 %v2674_v47  ;;  %v1291_v47 = vrot.slane %v1265_v44, %v2446_v35 }
 0x682   :  { %1480 = vmatprep.subr.bf16.mxu0 %v2677_v45  ;;  %1521 = vmatprep.subr.bf16.mxu1 %v2680_v50  ;;  %v1295_v50 = vrot.slane %v1265_v44, %v2448_v38 }
 0x683   :  { %1510 = vmatprep.mubr.bf16.mxu0 %v2236_v2  ;;  %1551 = vmatprep.mubr.bf16.mxu1 %v2236_v2  ;;  %v1261_v2 = vld [vmem:[%s1260_s20] sm:$0xf] }
 0x684   :  { %v1270_v37 = vrot.slane %v1261_v2, %v2446_v35  ;;  %v1274_v45 = vrot.slane %v1261_v2, %v2448_v38 }
 0x685   :  { %1481 = vmatpush1.bf16.msra.mxu0 %v2685_v36  ;;  %1522 = vmatpush1.bf16.msra.mxu1 %v2688_v53 }
 0x686   :  { %1482 = vmatprep.subr.bf16.mxu0 %v2691_v55  ;;  %1523 = vmatprep.subr.bf16.mxu1 %v2694_v49  ;;  %v1308_v36 = vsel %vm126_vm0, %v1270_v37, %v1291_v47  ;;  %v1309_v53 = vsel %vm126_vm0, %v1274_v45, %v1295_v50  ;;  %v1599_v37 = vld [vmem:[#allocation9 + $0x58] sm:$0xff]  ;;  %v1600_v45 = vld [vmem:[#allocation9 + $0x60] sm:$0xff]  ;;  %v1601_v50 = vld [vmem:[#allocation9 + $0x68] sm:$0xff] }
 0x689   :  { %1483 = vmatpush1.bf16.msra.mxu0 %v2697_v56  ;;  %1524 = vmatpush1.bf16.msra.mxu1 %v2700_v54 }
 0x68a   :  { %1484 = vmatprep.subr.bf16.mxu0 %v2703_v59  ;;  %1525 = vmatprep.subr.bf16.mxu1 %v2706_v61  ;;  %v1278_v61 = vrot.slane %v1261_v2, %v2454_v43 }
 0x68d   :  { %1485 = vmatpush1.bf16.msra.mxu0 %v2709_v52  ;;  %1526 = vmatpush1.bf16.msra.mxu1 %v2712_v3  ;;  %v1299_v52 = vrot.slane %v1265_v44, %v2454_v43 }
 0x68e   :  { %1486 = vmatprep.subr.bf16.mxu0 %v2715_v4  ;;  %1527 = vmatprep.subr.bf16.mxu1 %v2718_v5 }
 0x691   :  { %1487 = vmatpush1.bf16.msra.mxu0 %v2721_v7  ;;  %1528 = vmatpush1.bf16.msra.mxu1 %v2724_v8 }
 0x692   :  { %1488 = vmatprep.subr.bf16.mxu0 %v2727_v9  ;;  %1529 = vmatprep.subr.bf16.mxu1 %v2730_v10 }
 0x695   :  { %1489 = vmatpush1.bf16.msra.mxu0 %v2733_v6  ;;  %1530 = vmatpush1.bf16.msra.mxu1 %v2736_v11  ;;  %v1282_v6 = vrot.slane %v1261_v2, %v2460_v51  ;;  %v1303_v11 = vrot.slane %v1265_v44, %v2460_v51  ;;  %v1884_v2 = vpack.c.bf16 %v1597_v40, %v1596_v48  ;;  %v1598_v44 = vld [vmem:[#allocation9 + $0x50] sm:$0xff] }
 0x696   :  { %1490 = vmatprep.subr.bf16.mxu0 %v2739_v12  ;;  %1531 = vmatprep.subr.bf16.mxu1 %v2742_v13  ;;  %v1310_v12 = vsel %vm126_vm0, %v1278_v61, %v1299_v52  ;;  %v1887_v47 = vpack.c.bf16 %v1599_v37, %v1598_v44 }
 0x699   :  { %1491 = vmatpush1.bf16.msra.mxu0 %v2745_v14  ;;  %1532 = vmatpush1.bf16.msra.mxu1 %v2748_v15  ;;  %v1311_v14 = vsel %vm126_vm0, %v1282_v6, %v1303_v11 }
 0x69a   :  { %1492 = vmatprep.subr.bf16.mxu0 %v2751_v16  ;;  %1533 = vmatprep.subr.bf16.mxu1 %v2754_v17 }
 0x69d   :  { %1493 = vmatpush1.bf16.msra.mxu0 %v2757_v18  ;;  %1534 = vmatpush1.bf16.msra.mxu1 %v2760_v19 }
 0x69e   :  { %1871 = vmatprep.subr.bf16.mxu0 %v2237_v27 }
 0x753   :  { %v1347_v55 = vpop.f32.mrb[24].mxu0  ;;  %v1388_v49 = vpop.f32.mrb[24].mxu1 }
 0x754   :  { %v1395_v56 = vadd.f32 %v1347_v55, %v1308_v36  ;;  %v1349_v54 = vpop.f32.mrb[25].mxu0  ;;  %v1390_v59 = vpop.f32.mrb[25].mxu1  ;;  %v1397_v13 = vadd.f32 %v1388_v49, %v1310_v12  ;;  %v2239_v36 = vmov 0.0   ;;  %v1602_v55 = vld [vmem:[#allocation9 + $0x70] sm:$0xff]  ;;  %v1603_v49 = vld [vmem:[#allocation9 + $0x78] sm:$0xff] }
 0x755   :  { %v1396_v3 = vadd.f32 %v1349_v54, %v1309_v53  ;;  %v1351_v4 = vpop.f32.mrb[26].mxu0  ;;  %v1392_v5 = vpop.f32.mrb[26].mxu1  ;;  %v1398_v15 = vadd.f32 %v1390_v59, %v1311_v14  ;;  %v1890_v53 = vpack.c.bf16 %v1601_v50, %v1600_v45  ;;  %v1426_v54 = vld [vmem:[%s1425_s26] sm:$0xf] }
 0x756   :  { %v1808_v7 = vmul.f32 -1.442695, %v1395_v56  ;;  %v1352_v8 = vpop.f32.mrb[27].mxu0  ;;  %v1393_v9 = vpop.f32.mrb[27].mxu1  ;;  %v1810_v16 = vmul.f32 -1.442695, %v1397_v13  ;;  %v1893_v56 = vpack.c.bf16 %v1603_v49, %v1602_v55  ;;  %v1435_v61 = vrot.slane %v1426_v54, %v2446_v35 }
 0x757   :  { %v1809_v10 = vmul.f32 -1.442695, %v1396_v3  ;;  %v1430_v59 = vld [vmem:[%s1429_s27] sm:$0xf]  ;;  %v1439_v3 = vrot.slane %v1426_v54, %v2448_v38  ;;  %v1443_v12 = vrot.slane %v1426_v54, %v2454_v43 }
 0x758   :  { %2054 = vpow2.f32 %v1808_v7  ;;  %v1456_v52 = vrot.slane %v1430_v59, %v2446_v35  ;;  %v1460_v4 = vrot.slane %v1430_v59, %v2448_v38  ;;  %v1464_v13 = vrot.slane %v1430_v59, %v2454_v43 }
 0x759   :  { %2056 = vpow2.f32 %v1809_v10 }
 0x75a   :  { %2058 = vtanh.f32 %v1398_v15  ;;  %v1473_v5 = vsel %vm126_vm0, %v1435_v61, %v1456_v52  ;;  %v1474_v7 = vsel %vm126_vm0, %v1439_v3, %v1460_v4 }
 0x75b   :  { %2060 = vpow2.f32 %v1810_v16 }
 0x762   :  { %v2055_v17 = vpop.eup %2054 }
 0x763   :  { %v1408_v18 = vadd.f32 1.0, %v2055_v17  ;;  %v2057_v19 = vpop.eup %2056 }
 0x764   :  { %v1409_v33 = vadd.f32 1.0, %v2057_v19  ;;  %v2059_v60 = vpop.eup %2058  ;;  %v1447_v19 = vrot.slane %v1426_v54, %v2460_v51 }
 0x765   :  { %2062 = vrcp.f32 %v1408_v18  ;;  %v2061_v63 = vpop.eup %2060 }
 0x766   :  { %2064 = vrcp.f32 %v1409_v33  ;;  %v1410_v39 = vadd.f32 1.0, %v2061_v63  ;;  %v1468_v33 = vrot.slane %v1430_v59, %v2460_v51 }
 0x768   :  { %2066 = vrcp.f32 %v1410_v39 }
 0x76f   :  { %v2063_v57 = vpop.eup %2062 }
 0x770   :  { %v1419_v41 = vmul.f32 %v2063_v57, %v2059_v60  ;;  %v2065_v58 = vpop.eup %2064  ;;  %v1475_v60 = vsel %vm126_vm0, %v1443_v12, %v1464_v13  ;;  %v1476_v57 = vsel %vm126_vm0, %v1447_v19, %v1468_v33 }
 0x771   :  { %v1418_v42 = vmul.f32 %v2065_v58, %v2777_v34  ;;  %v1594_v34 = vld [vmem:[#allocation9 + $0x30] sm:$0xff] }
 0x772   :  { %v2067_v0 = vpop.eup %2066  ;;  %v1881_v62 = vpack.c.bf16 %v1595_v32, %v1594_v34 }
 0x773   :  { %v2825_v46 = vadd.f32 %v1419_v41, %v1418_v42 }
 0x775   :  { %2068 = vtanh.f32 %v2825_v46 }
 0x77f   :  { %v2069_v20 = vpop.eup %2068 }
 0x780   :  { %v1422_v23 = vmul.f32 %v2069_v20, %v2067_v0 }
 0x782   :  { %v1477_v24 = vpack.c.bf16 %v1422_v23, %v1422_v23 }
 0x784   :  { %1511 = vmatmul.mubr.bf16.vlgmr.msra.gmra.mrb[28].mxu0 %v1477_v24  ;;  %1552 = vmatmul.mubr.bf16.vlgmr.msra.gmra.mrb[28].mxu1 %v1477_v24 }
 0x785   :  { %1873 = vmatpush3.bf16.msra.mxu0 %v1872_v1  ;;  %1868 = vmatprep.mubr.msk.f32.mxu0 %vm2238_vm1, %v2239_v36 }
 0x786   :  { %1874 = vmatprep.subr.bf16.mxu0 %v2237_v27 }
 0x789   :  { %1876 = vmatpush3.bf16.msra.mxu0 %v1875_v22 }
 0x78a   :  { %1877 = vmatprep.subr.bf16.mxu0 %v2237_v27 }
 0x78d   :  { %1879 = vmatpush3.bf16.msra.mxu0 %v1878_v29 }
 0x78e   :  { %1880 = vmatprep.subr.bf16.mxu0 %v2237_v27 }
 0x791   :  { %1882 = vmatpush3.bf16.msra.mxu0 %v1881_v62 }
 0x792   :  { %1883 = vmatprep.subr.bf16.mxu0 %v2237_v27 }
 0x795   :  { %1885 = vmatpush3.bf16.msra.mxu0 %v1884_v2 }
 0x796   :  { %1886 = vmatprep.subr.bf16.mxu0 %v2237_v27 }
 0x799   :  { %1888 = vmatpush3.bf16.msra.mxu0 %v1887_v47 }
 0x79a   :  { %1889 = vmatprep.subr.bf16.mxu0 %v2237_v27 }
 0x79d   :  { %1891 = vmatpush3.bf16.msra.mxu0 %v1890_v53 }
 0x79e   :  { %1892 = vmatprep.subr.bf16.mxu0 %v2237_v27 }
 0x7a1   :  { %1894 = vmatpush3.bf16.msra.mxu0 %v1893_v56 }
 0x857   :  { %v1512_v8 = vpop.f32.mrb[28].mxu0  ;;  %v1553_v9 = vpop.f32.mrb[28].mxu1 }
 0x858   :  { %v1560_v10 = vadd.f32 %v1512_v8, %v1473_v5  ;;  %v1514_v6 = vpop.f32.mrb[29].mxu0  ;;  %v1555_v11 = vpop.f32.mrb[29].mxu1  ;;  %v1562_v63 = vadd.f32 %v1553_v9, %v1475_v60 }
 0x859   :  { %v1561_v14 = vadd.f32 %v1514_v6, %v1474_v7  ;;  %v1516_v15 = vpop.f32.mrb[30].mxu0  ;;  %v1557_v35 = vpop.f32.mrb[30].mxu1  ;;  %v1563_v41 = vadd.f32 %v1555_v11, %v1476_v57 }
 0x85a   :  { %v1815_v16 = vmul.f32 -1.442695, %v1560_v10  ;;  %v1517_v17 = vpop.f32.mrb[31].mxu0  ;;  %v1558_v18 = vpop.f32.mrb[31].mxu1  ;;  %v1817_v43 = vmul.f32 -1.442695, %v1562_v63 }
 0x85b   :  { %v1816_v38 = vmul.f32 -1.442695, %v1561_v14 }
 0x85c   :  { %2070 = vpow2.f32 %v1815_v16 }
 0x85d   :  { %2072 = vpow2.f32 %v1816_v38 }
 0x85e   :  { %2074 = vtanh.f32 %v1563_v41 }
 0x85f   :  { %2076 = vpow2.f32 %v1817_v43 }
 0x866   :  { %v2071_v58 = vpop.eup %2070 }
 0x867   :  { %v1573_v39 = vadd.f32 1.0, %v2071_v58  ;;  %v2073_v42 = vpop.eup %2072 }
 0x868   :  { %v1574_v0 = vadd.f32 1.0, %v2073_v42  ;;  %v2075_v20 = vpop.eup %2074 }
 0x869   :  { %2078 = vrcp.f32 %v1573_v39  ;;  %v2077_v23 = vpop.eup %2076 }
 0x86a   :  { %2080 = vrcp.f32 %v1574_v0  ;;  %v1575_v26 = vadd.f32 1.0, %v2077_v23 }
 0x86c   :  { %2082 = vrcp.f32 %v1575_v26 }
 0x873   :  { %v2079_v24 = vpop.eup %2078 }
 0x874   :  { %v1584_v51 = vmul.f32 %v2079_v24, %v2075_v20  ;;  %v2081_v25 = vpop.eup %2080 }
 0x875   :  { %v1583_v1 = vmul.f32 %v2081_v25, %v2825_v46 }
 0x876   :  { %v2083_v21 = vpop.eup %2082 }
 0x877   :  { %v1585_v27 = vadd.f32 %v1584_v51, %v1583_v1 }
 0x879   :  { %2084 = vtanh.f32 %v1585_v27 }
 0x883   :  { %v2085_v28 = vpop.eup %2084 }
 0x884   :  { %v1587_v22 = vmul.f32 %v2085_v28, %v2083_v21 }
 0x886   :  { %1869 = vmatmul.mubr.f32.vlgmr.msra.gmra.mrb[32].mxu0 %v1587_v22 }
 0x959   :  { %v1677_v31 = vpop.f32.mrb[32].mxu0 }
 0x95a   :  { %v1678_v29 = vadd.f32 %v1818_v30, %v1677_v31  ;;  %v1870_v34 = vpop.f32.mrb[33].mxu0 }
 0x95c   :  { %1681 = vst [vmem:[#allocation10] sm:$0x3] %v1678_v29 }
 0x95d   :  { %2207 = shalt.err (!%p2204_p5)
}
 0x95e   :  { %s2208_s8 = scalar_lea.hbm %s2861_s5, 32 }
 0x95f   :  { %p2209_p6 = scmp.ne.s32.totalorder %s2861_s5, %s2208_s8  ;;  %p2212_p7 = scmp.lt.u32.totalorder %s2208_s8, %s2861_s5 }
 0x961   :  { %p2214_p8 = pnand %p2212_p7, %p2209_p6 }
 0x963   :  { %2217 = shalt.err (!%p2214_p8)
}
 0x964   :  { %1691 = dma.vmem_to_hbm [thread:$0]  %s1689_s0, 32, %s2861_s5, [#allocation4]  }
 0x965   :  { %2224 = dma.done.wait [#allocation4], 32  }
 0x966   :  { %2225 = vsyncadd [#allocation4], 4294967264 }
 0x967   :  { %1695 = vsyncpa [#allocation3], 1 }
 0x968   :  { %1696 = vsyncpa [#allocation8], 1 }
 0x969   :  { %1697 = vsyncpa [#allocation4], 1 }
 0x96a   :  { %1698 = vsyncpa [#allocation5], 1 }

</bundles_post_ra>
